<compile_context>
chip_gen: v5e
topology: v5e:2x2
jax: 0.10.0
libtpu: 0.0.40
codegen_flags: <defaults>
</compile_context>

<pallas_src>
import functools

import jax
import jax.numpy as jnp
from jax import lax
from jax.experimental import pallas as pl
from jax.experimental.pallas import tpu as pltpu


def _round_up(n, m):
    return (n + m - 1) // m * m


def prompt_learner_kernel(x_ref, bp_ref, masks_ref,
                          w1_ref, t1_ref, w2_ref, t2_ref,
                          g1_ref, be1_ref, wl1_ref, bl1_ref,
                          g2_ref, be2_ref, wl2_ref, bl2_ref,
                          out_ref, *, H, W):
    HW = H * W

    def conv3x3_bn_relu(xa, w_ref, shift_ref):
        # xa: (rows_in, HW) channel-major.  w_ref: (9, rows_out, rows_in) per-tap block-diagonal
        # weights with the BN scale pre-folded.  shift_ref: (rows_out, 1) folded conv+BN shift.
        acc = None
        for t in range(9):
            dy, dx = t // 3 - 1, t % 3 - 1
            s = dy * W + dx
            xs = xa if s == 0 else pltpu.roll(xa, (-s) % HW, axis=1)   # XLU lane rotate
            if s != 0:
                xs = xs * masks_ref[t]                                  # (1, HW) boundary mask
            p = jnp.dot(w_ref[t], xs, preferred_element_type=jnp.float32)
            acc = p if acc is None else acc + p
        return jnp.maximum(acc + shift_ref[...], 0.0)

    def layer_norm(v, g, b, eps=1e-5):
        mu = jnp.mean(v, axis=-1, keepdims=True)
        var = jnp.mean((v - mu) ** 2, axis=-1, keepdims=True)
        return (v - mu) * lax.rsqrt(var + eps) * g + b

    x = x_ref[...]                                          # (block_b*Cp, HW)
    y1 = conv3x3_bn_relu(x, w1_ref, t1_ref)                 # (block_b*Mp, HW)
    bias = conv3x3_bn_relu(y1, w2_ref, t2_ref)              # (block_b*Mp, HW)

    bp = bp_ref[...] + bias                                 # (block_b*Mp, dim), dim == HW
    h = jnp.dot(layer_norm(bp, g1_ref[...], be1_ref[...]), wl1_ref[...],
                preferred_element_type=jnp.float32) + bl1_ref[...]
    out = jnp.dot(layer_norm(h, g2_ref[...], be2_ref[...]), wl2_ref[...],
                  preferred_element_type=jnp.float32) + bl2_ref[...]
    out_ref[...] = out.astype(out_ref.dtype)


def prompt_learner(x, bp_prompt, params, *, block_b=None, bn_eps=1e-5):
    """x: (B, in_planes, H, W) NCHW like the torch module; bp_prompt: (B, bp_num, H*W)."""
    B, C_in, H, W = x.shape
    _, bp_num, dim = bp_prompt.shape
    HW = H * W
    assert dim == HW, "LayerNorm(dim) in prompt_head requires dim == H*W"
    half = params["wl1"].shape[1]
    hidden = params["wl2"].shape[1]
    f32 = jnp.float32

    # Batch-fold block size: amortize per-grid-step overhead, keep >=2 steps when the batch
    # allows it (v7x has two TensorCores), cap to bound the block-diagonal weight growth.
    if block_b is None:
        block_b = B if B % 2 else max(1, B // 2)
        block_b = min(block_b, 8)
    block_b = max(1, min(block_b, B))
    while B % block_b:
        block_b -= 1
    n_steps = B // block_b

    Cp = _round_up(C_in, 8)       # pad channel counts so the batch-stacked sublane axis
    Mp = _round_up(bp_num, 8)     # stays a multiple of 8 for any block_b

    # ---- layout plumbing & parameter folding in the XLA wrapper, never in the kernel --------
    x_cm = jnp.pad(x.reshape(B, C_in, HW).astype(f32), ((0, 0), (0, Cp - C_in), (0, 0)))
    x2d = x_cm.reshape(B * Cp, HW)                               # channel-major, lane = H*W

    bp_pad = jnp.pad(bp_prompt.astype(f32), ((0, 0), (0, Mp - bp_num), (0, 0)))
    bp2d = bp_pad.reshape(B * Mp, dim)

    # 3x3-conv boundary masks for the roll-based taps (tap t = ky*3 + kx).
    yy = jnp.arange(HW, dtype=jnp.int32) // W
    xx = jnp.arange(HW, dtype=jnp.int32) % W
    masks = []
    for ky in range(3):
        for kx in range(3):
            dy, dx = ky - 1, kx - 1
            ok = ((yy + dy >= 0) & (yy + dy < H) & (xx + dx >= 0) & (xx + dx < W))
            masks.append(ok.astype(f32))
    masks = jnp.stack(masks).reshape(9, 1, HW)

    # TODO(synk): BatchNorm2d is folded in inference mode (running stats); training-mode batch
    # statistics are not computed in-kernel.
    def fold_conv_bn(w_hwio, conv_b, g, b, m, v, cin, cout, cin_p, cout_p):
        s = g * lax.rsqrt(v + bn_eps)                                     # (cout,)
        shift = (conv_b - m) * s + b                                      # (cout,)
        w_t = jnp.transpose(w_hwio, (0, 1, 3, 2)).reshape(9, cout, cin) * s[None, :, None]
        w_t = jnp.pad(w_t, ((0, 0), (0, cout_p - cout), (0, cin_p - cin)))
        eye_b = jnp.eye(block_b, dtype=f32)
        w_bd = jnp.einsum('ab,tmk->tambk', eye_b, w_t).reshape(
            9, block_b * cout_p, block_b * cin_p)                         # block-diag over images
        shift_col = jnp.tile(jnp.pad(shift, (0, cout_p - cout)), block_b)[:, None]
        return w_bd, shift_col

    w1_bd, t1_col = fold_conv_bn(params["conv1_w"], params["conv1_b"],
                                 params["bn1_g"], params["bn1_b"],
                                 params["bn1_m"], params["bn1_v"], C_in, bp_num, Cp, Mp)
    w2_bd, t2_col = fold_conv_bn(params["conv2_w"], params["conv2_b"],
                                 params["bn2_g"], params["bn2_b"],
                                 params["bn2_m"], params["bn2_v"], bp_num, bp_num, Mp, Mp)

    kernel = functools.partial(prompt_learner_kernel, H=H, W=W)

    def resident():  # whole array resident in VMEM, single-buffered (not grid-pipelined)
        return pl.BlockSpec(memory_space=pltpu.MemorySpace.VMEM)

    rows_x = block_b * Cp
    rows_m = block_b * Mp
    in_specs = [
        pl.BlockSpec((rows_x, HW), lambda b: (b, 0)),        # x block (channel-major)
        pl.BlockSpec((rows_m, dim), lambda b: (b, 0)),       # bp_prompt block
        resident(),                                          # tap boundary masks
        resident(), resident(),                              # conv1 taps / shift
        resident(), resident(),                              # conv2 taps / shift
        resident(), resident(), resident(), resident(),      # ln1 g/b, lin1 W/b
        resident(), resident(), resident(), resident(),      # ln2 g/b, lin2 W/b
    ]

    flops = (2 * n_steps * 9 * HW * rows_m * (rows_x + rows_m)
             + 2 * B * Mp * (dim * half + half * hidden))
    bytes_accessed = 4 * (x2d.size + bp2d.size + B * Mp * hidden + masks.size
                          + w1_bd.size + w2_bd.size + 2 * rows_m
                          + params["wl1"].size + params["wl2"].size
                          + 2 * dim + 3 * half + 2 * hidden)

    block_bytes = 4 * (rows_x * HW + rows_m * dim + rows_m * hidden)
    resident_bytes = 4 * (masks.size + w1_bd.size + w2_bd.size + 2 * rows_m
                          + 2 * dim + params["wl1"].size + half
                          + 2 * half + params["wl2"].size + hidden)
    vmem_limit = int(min(32 * 1024 * 1024,
                         max(8 * 1024 * 1024, 4 * (2 * block_bytes + resident_bytes))))

    out2d = pl.pallas_call(
        kernel,
        out_shape=jax.ShapeDtypeStruct((B * Mp, hidden), bp_prompt.dtype),
        grid=(n_steps,),
        in_specs=in_specs,
        out_specs=pl.BlockSpec((rows_m, hidden), lambda b: (b, 0)),
        compiler_params=pltpu.CompilerParams(
            dimension_semantics=("parallel",),
            vmem_limit_bytes=vmem_limit),
        cost_estimate=pl.CostEstimate(flops=flops,
                                      transcendentals=4 * B * Mp,
                                      bytes_accessed=bytes_accessed),
    )(x2d, bp2d, masks,
      w1_bd, t1_col, w2_bd, t2_col,
      params["ln1_g"].reshape(1, dim).astype(f32), params["ln1_b"].reshape(1, dim).astype(f32),
      params["wl1"].astype(f32), params["bl1"].reshape(1, half).astype(f32),
      params["ln2_g"].reshape(1, half).astype(f32), params["ln2_b"].reshape(1, half).astype(f32),
      params["wl2"].astype(f32), params["bl2"].reshape(1, hidden).astype(f32))

    return out2d.reshape(B, Mp, hidden)[:, :bp_num, :]


def prompt_learner_ref(x, bp_prompt, params, bn_eps=1e-5):
    """Pure-JAX reference mirroring the PyTorch forward (eval-mode BN)."""
    B, C_in, H, W = x.shape
    dn = ("NCHW", "HWIO", "NCHW")
    hp = lax.Precision.HIGHEST

    def bn(y, g, b, m, v):
        inv = lax.rsqrt(v + bn_eps)
        return (y - m[None, :, None, None]) * inv[None, :, None, None] \
            * g[None, :, None, None] + b[None, :, None, None]

    y = lax.conv_general_dilated(x, params["conv1_w"], (1, 1), "SAME",
                                 dimension_numbers=dn, precision=hp)
    y = y + params["conv1_b"][None, :, None, None]
    y = jnp.maximum(bn(y, params["bn1_g"], params["bn1_b"], params["bn1_m"], params["bn1_v"]), 0.0)
    y = lax.conv_general_dilated(y, params["conv2_w"], (1, 1), "SAME",
                                 dimension_numbers=dn, precision=hp)
    y = y + params["conv2_b"][None, :, None, None]
    y = jnp.maximum(bn(y, params["bn2_g"], params["bn2_b"], params["bn2_m"], params["bn2_v"]), 0.0)
    bias = y.reshape(B, -1, H * W)                            # 'b c p1 p2 -> b c (p1 p2)'
    bp = bp_prompt + bias

    def ln(v, g, b):
        mu = jnp.mean(v, -1, keepdims=True)
        var = jnp.mean((v - mu) ** 2, -1, keepdims=True)
        return (v - mu) / jnp.sqrt(var + 1e-5) * g + b

    h = jnp.dot(ln(bp, params["ln1_g"], params["ln1_b"]), params["wl1"], precision=hp) \
        + params["bl1"]
    return jnp.dot(ln(h, params["ln2_g"], params["ln2_b"]), params["wl2"], precision=hp) \
        + params["bl2"]


if __name__ == "__main__":
    # Small shapes consistent with the module: x (batch, in_planes, 16, 16),
    # bp_prompt (batch, bp_num, dim) with dim = 16*16 = 256, hidden_dim = 32.
    B, C_in, H, W = 2, 4, 16, 16
    bp_num, hidden = 8, 32
    dim = H * W
    half = dim // 2

    key = jax.random.PRNGKey(0)
    ks = jax.random.split(key, 20)

    def init(k, shape, s=0.05):
        return jax.random.normal(k, shape, jnp.float32) * s

    params = dict(
        conv1_w=init(ks[0], (3, 3, C_in, bp_num)),
        conv1_b=init(ks[1], (bp_num,)),
        bn1_g=1.0 + init(ks[2], (bp_num,)), bn1_b=init(ks[3], (bp_num,)),
        bn1_m=init(ks[4], (bp_num,)),
        bn1_v=jax.random.uniform(ks[5], (bp_num,), jnp.float32, 0.5, 1.5),
        conv2_w=init(ks[6], (3, 3, bp_num, bp_num)),
        conv2_b=init(ks[7], (bp_num,)),
        bn2_g=1.0 + init(ks[8], (bp_num,)), bn2_b=init(ks[9], (bp_num,)),
        bn2_m=init(ks[10], (bp_num,)),
        bn2_v=jax.random.uniform(ks[11], (bp_num,), jnp.float32, 0.5, 1.5),
        ln1_g=jnp.ones((dim,), jnp.float32), ln1_b=jnp.zeros((dim,), jnp.float32),
        wl1=init(ks[12], (dim, half)), bl1=init(ks[13], (half,)),
        ln2_g=jnp.ones((half,), jnp.float32), ln2_b=jnp.zeros((half,), jnp.float32),
        wl2=init(ks[14], (half, hidden)), bl2=init(ks[15], (hidden,)),
    )

    x = jax.random.normal(ks[16], (B, C_in, H, W), jnp.float32)
    bp_prompt = jax.random.normal(ks[17], (B, bp_num, dim), jnp.float32)

    out = prompt_learner(x, bp_prompt, params)
    jax.block_until_ready(out)

    ref = prompt_learner_ref(x, bp_prompt, params)
    assert out.shape == (B, bp_num, hidden)
    assert jnp.allclose(out, ref, atol=1e-3, rtol=1e-3), "mismatch vs pure-JAX reference"

    print("KERNEL_OK")
</pallas_src>

<mosaic_0001>
module attributes {stable_mosaic.version = 11 : i64} {
  func.func @prompt_learner_kernel(%arg0: i32, %arg1: memref<8x256xf32, #tpu.memory_space<vmem>>, %arg2: memref<8x256xf32, #tpu.memory_space<vmem>>, %arg3: memref<9x1x256xf32, #tpu.memory_space<vmem>>, %arg4: memref<9x8x8xf32, #tpu.memory_space<vmem>>, %arg5: memref<8x1xf32, #tpu.memory_space<vmem>>, %arg6: memref<9x8x8xf32, #tpu.memory_space<vmem>>, %arg7: memref<8x1xf32, #tpu.memory_space<vmem>>, %arg8: memref<1x256xf32, #tpu.memory_space<vmem>>, %arg9: memref<1x256xf32, #tpu.memory_space<vmem>>, %arg10: memref<256x128xf32, #tpu.memory_space<vmem>>, %arg11: memref<1x128xf32, #tpu.memory_space<vmem>>, %arg12: memref<1x128xf32, #tpu.memory_space<vmem>>, %arg13: memref<1x128xf32, #tpu.memory_space<vmem>>, %arg14: memref<128x32xf32, #tpu.memory_space<vmem>>, %arg15: memref<1x32xf32, #tpu.memory_space<vmem>>, %arg16: memref<8x32xf32, #tpu.memory_space<vmem>>) attributes {dimension_semantics = [#tpu.dimension_semantics<parallel>], iteration_bounds = array<i64: 2>, scalar_prefetch = 0 : i64, scratch_operands = 0 : i64, tpu.core_type = #tpu.core_type<tc>, window_params = [{transform_indices = @transform_0, window_bounds = array<i64: 8, 256>}, {transform_indices = @transform_1, window_bounds = array<i64: 8, 256>}, {pipeline_mode = #tpu.pipeline_mode<synchronous>, transform_indices = @transform_2, window_bounds = array<i64: 9, 1, 256>}, {pipeline_mode = #tpu.pipeline_mode<synchronous>, transform_indices = @transform_3, window_bounds = array<i64: 9, 8, 8>}, {pipeline_mode = #tpu.pipeline_mode<synchronous>, transform_indices = @transform_4, window_bounds = array<i64: 8, 1>}, {pipeline_mode = #tpu.pipeline_mode<synchronous>, transform_indices = @transform_5, window_bounds = array<i64: 9, 8, 8>}, {pipeline_mode = #tpu.pipeline_mode<synchronous>, transform_indices = @transform_6, window_bounds = array<i64: 8, 1>}, {pipeline_mode = #tpu.pipeline_mode<synchronous>, transform_indices = @transform_7, window_bounds = array<i64: 1, 256>}, {pipeline_mode = #tpu.pipeline_mode<synchronous>, transform_indices = @transform_8, window_bounds = array<i64: 1, 256>}, {pipeline_mode = #tpu.pipeline_mode<synchronous>, transform_indices = @transform_9, window_bounds = array<i64: 256, 128>}, {pipeline_mode = #tpu.pipeline_mode<synchronous>, transform_indices = @transform_10, window_bounds = array<i64: 1, 128>}, {pipeline_mode = #tpu.pipeline_mode<synchronous>, transform_indices = @transform_11, window_bounds = array<i64: 1, 128>}, {pipeline_mode = #tpu.pipeline_mode<synchronous>, transform_indices = @transform_12, window_bounds = array<i64: 1, 128>}, {pipeline_mode = #tpu.pipeline_mode<synchronous>, transform_indices = @transform_13, window_bounds = array<i64: 128, 32>}, {pipeline_mode = #tpu.pipeline_mode<synchronous>, transform_indices = @transform_14, window_bounds = array<i64: 1, 32>}, {transform_indices = @transform_15, window_bounds = array<i64: 8, 32>}]} {
    %c0 = arith.constant 0 : index
    %c0_0 = arith.constant 0 : index
    %0 = vector.load %arg1[%c0, %c0_0] : memref<8x256xf32, #tpu.memory_space<vmem>>, vector<8x256xf32>
    %c17_i32 = arith.constant 17 : i32
    %1 = tpu.dynamic_rotate %0 by %c17_i32 dim 1 : vector<8x256xf32>, i32 -> vector<8x256xf32>
    %c0_1 = arith.constant 0 : index
    %c0_2 = arith.constant 0 : index
    %c0_3 = arith.constant 0 : index
    %2 = vector.load %arg3[%c0_1, %c0_2, %c0_3] : memref<9x1x256xf32, #tpu.memory_space<vmem>>, vector<1x1x256xf32>
    %3 = vector.shape_cast %2 : vector<1x1x256xf32> to vector<1x256xf32>
    %4 = vector.broadcast %3 : vector<1x256xf32> to vector<8x256xf32>
    %5 = arith.mulf %1, %4 : vector<8x256xf32>
    %c0_4 = arith.constant 0 : index
    %c0_5 = arith.constant 0 : index
    %c0_6 = arith.constant 0 : index
    %6 = vector.load %arg4[%c0_4, %c0_5, %c0_6] : memref<9x8x8xf32, #tpu.memory_space<vmem>>, vector<1x8x8xf32>
    %7 = vector.shape_cast %6 : vector<1x8x8xf32> to vector<8x8xf32>
    %cst = arith.constant dense<0.000000e+00> : vector<8x256xf32>
    %8 = tpu.matmul %7, %5, %cst {dimension_numbers = #tpu.dot_dimension_numbers<[1], [0], [0], [1], [0, 0, 1, 1], [], []>} : vector<8x8xf32>, vector<8x256xf32>, vector<8x256xf32> -> vector<8x256xf32>
    %c16_i32 = arith.constant 16 : i32
    %9 = tpu.dynamic_rotate %0 by %c16_i32 dim 1 : vector<8x256xf32>, i32 -> vector<8x256xf32>
    %c1 = arith.constant 1 : index
    %c0_7 = arith.constant 0 : index
    %c0_8 = arith.constant 0 : index
    %10 = vector.load %arg3[%c1, %c0_7, %c0_8] : memref<9x1x256xf32, #tpu.memory_space<vmem>>, vector<1x1x256xf32>
    %11 = vector.shape_cast %10 : vector<1x1x256xf32> to vector<1x256xf32>
    %12 = vector.broadcast %11 : vector<1x256xf32> to vector<8x256xf32>
    %13 = arith.mulf %9, %12 : vector<8x256xf32>
    %c1_9 = arith.constant 1 : index
    %c0_10 = arith.constant 0 : index
    %c0_11 = arith.constant 0 : index
    %14 = vector.load %arg4[%c1_9, %c0_10, %c0_11] : memref<9x8x8xf32, #tpu.memory_space<vmem>>, vector<1x8x8xf32>
    %15 = vector.shape_cast %14 : vector<1x8x8xf32> to vector<8x8xf32>
    %cst_12 = arith.constant dense<0.000000e+00> : vector<8x256xf32>
    %16 = tpu.matmul %15, %13, %cst_12 {dimension_numbers = #tpu.dot_dimension_numbers<[1], [0], [0], [1], [0, 0, 1, 1], [], []>} : vector<8x8xf32>, vector<8x256xf32>, vector<8x256xf32> -> vector<8x256xf32>
    %17 = arith.addf %8, %16 : vector<8x256xf32>
    %c15_i32 = arith.constant 15 : i32
    %18 = tpu.dynamic_rotate %0 by %c15_i32 dim 1 : vector<8x256xf32>, i32 -> vector<8x256xf32>
    %c2 = arith.constant 2 : index
    %c0_13 = arith.constant 0 : index
    %c0_14 = arith.constant 0 : index
    %19 = vector.load %arg3[%c2, %c0_13, %c0_14] : memref<9x1x256xf32, #tpu.memory_space<vmem>>, vector<1x1x256xf32>
    %20 = vector.shape_cast %19 : vector<1x1x256xf32> to vector<1x256xf32>
    %21 = vector.broadcast %20 : vector<1x256xf32> to vector<8x256xf32>
    %22 = arith.mulf %18, %21 : vector<8x256xf32>
    %c2_15 = arith.constant 2 : index
    %c0_16 = arith.constant 0 : index
    %c0_17 = arith.constant 0 : index
    %23 = vector.load %arg4[%c2_15, %c0_16, %c0_17] : memref<9x8x8xf32, #tpu.memory_space<vmem>>, vector<1x8x8xf32>
    %24 = vector.shape_cast %23 : vector<1x8x8xf32> to vector<8x8xf32>
    %cst_18 = arith.constant dense<0.000000e+00> : vector<8x256xf32>
    %25 = tpu.matmul %24, %22, %cst_18 {dimension_numbers = #tpu.dot_dimension_numbers<[1], [0], [0], [1], [0, 0, 1, 1], [], []>} : vector<8x8xf32>, vector<8x256xf32>, vector<8x256xf32> -> vector<8x256xf32>
    %26 = arith.addf %17, %25 : vector<8x256xf32>
    %c1_i32 = arith.constant 1 : i32
    %27 = tpu.dynamic_rotate %0 by %c1_i32 dim 1 : vector<8x256xf32>, i32 -> vector<8x256xf32>
    %c3 = arith.constant 3 : index
    %c0_19 = arith.constant 0 : index
    %c0_20 = arith.constant 0 : index
    %28 = vector.load %arg3[%c3, %c0_19, %c0_20] : memref<9x1x256xf32, #tpu.memory_space<vmem>>, vector<1x1x256xf32>
    %29 = vector.shape_cast %28 : vector<1x1x256xf32> to vector<1x256xf32>
    %30 = vector.broadcast %29 : vector<1x256xf32> to vector<8x256xf32>
    %31 = arith.mulf %27, %30 : vector<8x256xf32>
    %c3_21 = arith.constant 3 : index
    %c0_22 = arith.constant 0 : index
    %c0_23 = arith.constant 0 : index
    %32 = vector.load %arg4[%c3_21, %c0_22, %c0_23] : memref<9x8x8xf32, #tpu.memory_space<vmem>>, vector<1x8x8xf32>
    %33 = vector.shape_cast %32 : vector<1x8x8xf32> to vector<8x8xf32>
    %cst_24 = arith.constant dense<0.000000e+00> : vector<8x256xf32>
    %34 = tpu.matmul %33, %31, %cst_24 {dimension_numbers = #tpu.dot_dimension_numbers<[1], [0], [0], [1], [0, 0, 1, 1], [], []>} : vector<8x8xf32>, vector<8x256xf32>, vector<8x256xf32> -> vector<8x256xf32>
    %35 = arith.addf %26, %34 : vector<8x256xf32>
    %c4 = arith.constant 4 : index
    %c0_25 = arith.constant 0 : index
    %c0_26 = arith.constant 0 : index
    %36 = vector.load %arg4[%c4, %c0_25, %c0_26] : memref<9x8x8xf32, #tpu.memory_space<vmem>>, vector<1x8x8xf32>
    %37 = vector.shape_cast %36 : vector<1x8x8xf32> to vector<8x8xf32>
    %cst_27 = arith.constant dense<0.000000e+00> : vector<8x256xf32>
    %38 = tpu.matmul %37, %0, %cst_27 {dimension_numbers = #tpu.dot_dimension_numbers<[1], [0], [0], [1], [0, 0, 1, 1], [], []>} : vector<8x8xf32>, vector<8x256xf32>, vector<8x256xf32> -> vector<8x256xf32>
    %39 = arith.addf %35, %38 : vector<8x256xf32>
    %c255_i32 = arith.constant 255 : i32
    %40 = tpu.dynamic_rotate %0 by %c255_i32 dim 1 : vector<8x256xf32>, i32 -> vector<8x256xf32>
    %c5 = arith.constant 5 : index
    %c0_28 = arith.constant 0 : index
    %c0_29 = arith.constant 0 : index
    %41 = vector.load %arg3[%c5, %c0_28, %c0_29] : memref<9x1x256xf32, #tpu.memory_space<vmem>>, vector<1x1x256xf32>
    %42 = vector.shape_cast %41 : vector<1x1x256xf32> to vector<1x256xf32>
    %43 = vector.broadcast %42 : vector<1x256xf32> to vector<8x256xf32>
    %44 = arith.mulf %40, %43 : vector<8x256xf32>
    %c5_30 = arith.constant 5 : index
    %c0_31 = arith.constant 0 : index
    %c0_32 = arith.constant 0 : index
    %45 = vector.load %arg4[%c5_30, %c0_31, %c0_32] : memref<9x8x8xf32, #tpu.memory_space<vmem>>, vector<1x8x8xf32>
    %46 = vector.shape_cast %45 : vector<1x8x8xf32> to vector<8x8xf32>
    %cst_33 = arith.constant dense<0.000000e+00> : vector<8x256xf32>
    %47 = tpu.matmul %46, %44, %cst_33 {dimension_numbers = #tpu.dot_dimension_numbers<[1], [0], [0], [1], [0, 0, 1, 1], [], []>} : vector<8x8xf32>, vector<8x256xf32>, vector<8x256xf32> -> vector<8x256xf32>
    %48 = arith.addf %39, %47 : vector<8x256xf32>
    %c241_i32 = arith.constant 241 : i32
    %49 = tpu.dynamic_rotate %0 by %c241_i32 dim 1 : vector<8x256xf32>, i32 -> vector<8x256xf32>
    %c6 = arith.constant 6 : index
    %c0_34 = arith.constant 0 : index
    %c0_35 = arith.constant 0 : index
    %50 = vector.load %arg3[%c6, %c0_34, %c0_35] : memref<9x1x256xf32, #tpu.memory_space<vmem>>, vector<1x1x256xf32>
    %51 = vector.shape_cast %50 : vector<1x1x256xf32> to vector<1x256xf32>
    %52 = vector.broadcast %51 : vector<1x256xf32> to vector<8x256xf32>
    %53 = arith.mulf %49, %52 : vector<8x256xf32>
    %c6_36 = arith.constant 6 : index
    %c0_37 = arith.constant 0 : index
    %c0_38 = arith.constant 0 : index
    %54 = vector.load %arg4[%c6_36, %c0_37, %c0_38] : memref<9x8x8xf32, #tpu.memory_space<vmem>>, vector<1x8x8xf32>
    %55 = vector.shape_cast %54 : vector<1x8x8xf32> to vector<8x8xf32>
    %cst_39 = arith.constant dense<0.000000e+00> : vector<8x256xf32>
    %56 = tpu.matmul %55, %53, %cst_39 {dimension_numbers = #tpu.dot_dimension_numbers<[1], [0], [0], [1], [0, 0, 1, 1], [], []>} : vector<8x8xf32>, vector<8x256xf32>, vector<8x256xf32> -> vector<8x256xf32>
    %57 = arith.addf %48, %56 : vector<8x256xf32>
    %c240_i32 = arith.constant 240 : i32
    %58 = tpu.dynamic_rotate %0 by %c240_i32 dim 1 : vector<8x256xf32>, i32 -> vector<8x256xf32>
    %c7 = arith.constant 7 : index
    %c0_40 = arith.constant 0 : index
    %c0_41 = arith.constant 0 : index
    %59 = vector.load %arg3[%c7, %c0_40, %c0_41] : memref<9x1x256xf32, #tpu.memory_space<vmem>>, vector<1x1x256xf32>
    %60 = vector.shape_cast %59 : vector<1x1x256xf32> to vector<1x256xf32>
    %61 = vector.broadcast %60 : vector<1x256xf32> to vector<8x256xf32>
    %62 = arith.mulf %58, %61 : vector<8x256xf32>
    %c7_42 = arith.constant 7 : index
    %c0_43 = arith.constant 0 : index
    %c0_44 = arith.constant 0 : index
    %63 = vector.load %arg4[%c7_42, %c0_43, %c0_44] : memref<9x8x8xf32, #tpu.memory_space<vmem>>, vector<1x8x8xf32>
    %64 = vector.shape_cast %63 : vector<1x8x8xf32> to vector<8x8xf32>
    %cst_45 = arith.constant dense<0.000000e+00> : vector<8x256xf32>
    %65 = tpu.matmul %64, %62, %cst_45 {dimension_numbers = #tpu.dot_dimension_numbers<[1], [0], [0], [1], [0, 0, 1, 1], [], []>} : vector<8x8xf32>, vector<8x256xf32>, vector<8x256xf32> -> vector<8x256xf32>
    %66 = arith.addf %57, %65 : vector<8x256xf32>
    %c239_i32 = arith.constant 239 : i32
    %67 = tpu.dynamic_rotate %0 by %c239_i32 dim 1 : vector<8x256xf32>, i32 -> vector<8x256xf32>
    %c8 = arith.constant 8 : index
    %c0_46 = arith.constant 0 : index
    %c0_47 = arith.constant 0 : index
    %68 = vector.load %arg3[%c8, %c0_46, %c0_47] : memref<9x1x256xf32, #tpu.memory_space<vmem>>, vector<1x1x256xf32>
    %69 = vector.shape_cast %68 : vector<1x1x256xf32> to vector<1x256xf32>
    %70 = vector.broadcast %69 : vector<1x256xf32> to vector<8x256xf32>
    %71 = arith.mulf %67, %70 : vector<8x256xf32>
    %c8_48 = arith.constant 8 : index
    %c0_49 = arith.constant 0 : index
    %c0_50 = arith.constant 0 : index
    %72 = vector.load %arg4[%c8_48, %c0_49, %c0_50] : memref<9x8x8xf32, #tpu.memory_space<vmem>>, vector<1x8x8xf32>
    %73 = vector.shape_cast %72 : vector<1x8x8xf32> to vector<8x8xf32>
    %cst_51 = arith.constant dense<0.000000e+00> : vector<8x256xf32>
    %74 = tpu.matmul %73, %71, %cst_51 {dimension_numbers = #tpu.dot_dimension_numbers<[1], [0], [0], [1], [0, 0, 1, 1], [], []>} : vector<8x8xf32>, vector<8x256xf32>, vector<8x256xf32> -> vector<8x256xf32>
    %75 = arith.addf %66, %74 : vector<8x256xf32>
    %c0_52 = arith.constant 0 : index
    %c0_53 = arith.constant 0 : index
    %76 = vector.load %arg5[%c0_52, %c0_53] : memref<8x1xf32, #tpu.memory_space<vmem>>, vector<8x1xf32>
    %77 = vector.broadcast %76 : vector<8x1xf32> to vector<8x256xf32>
    %78 = arith.addf %75, %77 : vector<8x256xf32>
    %cst_54 = arith.constant 0.000000e+00 : f32
    %79 = vector.broadcast %cst_54 : f32 to vector<8x256xf32>
    %80 = arith.maximumf %78, %79 : vector<8x256xf32>
    %c17_i32_55 = arith.constant 17 : i32
    %81 = tpu.dynamic_rotate %80 by %c17_i32_55 dim 1 : vector<8x256xf32>, i32 -> vector<8x256xf32>
    %c0_56 = arith.constant 0 : index
    %c0_57 = arith.constant 0 : index
    %c0_58 = arith.constant 0 : index
    %82 = vector.load %arg3[%c0_56, %c0_57, %c0_58] : memref<9x1x256xf32, #tpu.memory_space<vmem>>, vector<1x1x256xf32>
    %83 = vector.shape_cast %82 : vector<1x1x256xf32> to vector<1x256xf32>
    %84 = vector.broadcast %83 : vector<1x256xf32> to vector<8x256xf32>
    %85 = arith.mulf %81, %84 : vector<8x256xf32>
    %c0_59 = arith.constant 0 : index
    %c0_60 = arith.constant 0 : index
    %c0_61 = arith.constant 0 : index
    %86 = vector.load %arg6[%c0_59, %c0_60, %c0_61] : memref<9x8x8xf32, #tpu.memory_space<vmem>>, vector<1x8x8xf32>
    %87 = vector.shape_cast %86 : vector<1x8x8xf32> to vector<8x8xf32>
    %cst_62 = arith.constant dense<0.000000e+00> : vector<8x256xf32>
    %88 = tpu.matmul %87, %85, %cst_62 {dimension_numbers = #tpu.dot_dimension_numbers<[1], [0], [0], [1], [0, 0, 1, 1], [], []>} : vector<8x8xf32>, vector<8x256xf32>, vector<8x256xf32> -> vector<8x256xf32>
    %c16_i32_63 = arith.constant 16 : i32
    %89 = tpu.dynamic_rotate %80 by %c16_i32_63 dim 1 : vector<8x256xf32>, i32 -> vector<8x256xf32>
    %c1_64 = arith.constant 1 : index
    %c0_65 = arith.constant 0 : index
    %c0_66 = arith.constant 0 : index
    %90 = vector.load %arg3[%c1_64, %c0_65, %c0_66] : memref<9x1x256xf32, #tpu.memory_space<vmem>>, vector<1x1x256xf32>
    %91 = vector.shape_cast %90 : vector<1x1x256xf32> to vector<1x256xf32>
    %92 = vector.broadcast %91 : vector<1x256xf32> to vector<8x256xf32>
    %93 = arith.mulf %89, %92 : vector<8x256xf32>
    %c1_67 = arith.constant 1 : index
    %c0_68 = arith.constant 0 : index
    %c0_69 = arith.constant 0 : index
    %94 = vector.load %arg6[%c1_67, %c0_68, %c0_69] : memref<9x8x8xf32, #tpu.memory_space<vmem>>, vector<1x8x8xf32>
    %95 = vector.shape_cast %94 : vector<1x8x8xf32> to vector<8x8xf32>
    %cst_70 = arith.constant dense<0.000000e+00> : vector<8x256xf32>
    %96 = tpu.matmul %95, %93, %cst_70 {dimension_numbers = #tpu.dot_dimension_numbers<[1], [0], [0], [1], [0, 0, 1, 1], [], []>} : vector<8x8xf32>, vector<8x256xf32>, vector<8x256xf32> -> vector<8x256xf32>
    %97 = arith.addf %88, %96 : vector<8x256xf32>
    %c15_i32_71 = arith.constant 15 : i32
    %98 = tpu.dynamic_rotate %80 by %c15_i32_71 dim 1 : vector<8x256xf32>, i32 -> vector<8x256xf32>
    %c2_72 = arith.constant 2 : index
    %c0_73 = arith.constant 0 : index
    %c0_74 = arith.constant 0 : index
    %99 = vector.load %arg3[%c2_72, %c0_73, %c0_74] : memref<9x1x256xf32, #tpu.memory_space<vmem>>, vector<1x1x256xf32>
    %100 = vector.shape_cast %99 : vector<1x1x256xf32> to vector<1x256xf32>
    %101 = vector.broadcast %100 : vector<1x256xf32> to vector<8x256xf32>
    %102 = arith.mulf %98, %101 : vector<8x256xf32>
    %c2_75 = arith.constant 2 : index
    %c0_76 = arith.constant 0 : index
    %c0_77 = arith.constant 0 : index
    %103 = vector.load %arg6[%c2_75, %c0_76, %c0_77] : memref<9x8x8xf32, #tpu.memory_space<vmem>>, vector<1x8x8xf32>
    %104 = vector.shape_cast %103 : vector<1x8x8xf32> to vector<8x8xf32>
    %cst_78 = arith.constant dense<0.000000e+00> : vector<8x256xf32>
    %105 = tpu.matmul %104, %102, %cst_78 {dimension_numbers = #tpu.dot_dimension_numbers<[1], [0], [0], [1], [0, 0, 1, 1], [], []>} : vector<8x8xf32>, vector<8x256xf32>, vector<8x256xf32> -> vector<8x256xf32>
    %106 = arith.addf %97, %105 : vector<8x256xf32>
    %c1_i32_79 = arith.constant 1 : i32
    %107 = tpu.dynamic_rotate %80 by %c1_i32_79 dim 1 : vector<8x256xf32>, i32 -> vector<8x256xf32>
    %c3_80 = arith.constant 3 : index
    %c0_81 = arith.constant 0 : index
    %c0_82 = arith.constant 0 : index
    %108 = vector.load %arg3[%c3_80, %c0_81, %c0_82] : memref<9x1x256xf32, #tpu.memory_space<vmem>>, vector<1x1x256xf32>
    %109 = vector.shape_cast %108 : vector<1x1x256xf32> to vector<1x256xf32>
    %110 = vector.broadcast %109 : vector<1x256xf32> to vector<8x256xf32>
    %111 = arith.mulf %107, %110 : vector<8x256xf32>
    %c3_83 = arith.constant 3 : index
    %c0_84 = arith.constant 0 : index
    %c0_85 = arith.constant 0 : index
    %112 = vector.load %arg6[%c3_83, %c0_84, %c0_85] : memref<9x8x8xf32, #tpu.memory_space<vmem>>, vector<1x8x8xf32>
    %113 = vector.shape_cast %112 : vector<1x8x8xf32> to vector<8x8xf32>
    %cst_86 = arith.constant dense<0.000000e+00> : vector<8x256xf32>
    %114 = tpu.matmul %113, %111, %cst_86 {dimension_numbers = #tpu.dot_dimension_numbers<[1], [0], [0], [1], [0, 0, 1, 1], [], []>} : vector<8x8xf32>, vector<8x256xf32>, vector<8x256xf32> -> vector<8x256xf32>
    %115 = arith.addf %106, %114 : vector<8x256xf32>
    %c4_87 = arith.constant 4 : index
    %c0_88 = arith.constant 0 : index
    %c0_89 = arith.constant 0 : index
    %116 = vector.load %arg6[%c4_87, %c0_88, %c0_89] : memref<9x8x8xf32, #tpu.memory_space<vmem>>, vector<1x8x8xf32>
    %117 = vector.shape_cast %116 : vector<1x8x8xf32> to vector<8x8xf32>
    %cst_90 = arith.constant dense<0.000000e+00> : vector<8x256xf32>
    %118 = tpu.matmul %117, %80, %cst_90 {dimension_numbers = #tpu.dot_dimension_numbers<[1], [0], [0], [1], [0, 0, 1, 1], [], []>} : vector<8x8xf32>, vector<8x256xf32>, vector<8x256xf32> -> vector<8x256xf32>
    %119 = arith.addf %115, %118 : vector<8x256xf32>
    %c255_i32_91 = arith.constant 255 : i32
    %120 = tpu.dynamic_rotate %80 by %c255_i32_91 dim 1 : vector<8x256xf32>, i32 -> vector<8x256xf32>
    %c5_92 = arith.constant 5 : index
    %c0_93 = arith.constant 0 : index
    %c0_94 = arith.constant 0 : index
    %121 = vector.load %arg3[%c5_92, %c0_93, %c0_94] : memref<9x1x256xf32, #tpu.memory_space<vmem>>, vector<1x1x256xf32>
    %122 = vector.shape_cast %121 : vector<1x1x256xf32> to vector<1x256xf32>
    %123 = vector.broadcast %122 : vector<1x256xf32> to vector<8x256xf32>
    %124 = arith.mulf %120, %123 : vector<8x256xf32>
    %c5_95 = arith.constant 5 : index
    %c0_96 = arith.constant 0 : index
    %c0_97 = arith.constant 0 : index
    %125 = vector.load %arg6[%c5_95, %c0_96, %c0_97] : memref<9x8x8xf32, #tpu.memory_space<vmem>>, vector<1x8x8xf32>
    %126 = vector.shape_cast %125 : vector<1x8x8xf32> to vector<8x8xf32>
    %cst_98 = arith.constant dense<0.000000e+00> : vector<8x256xf32>
    %127 = tpu.matmul %126, %124, %cst_98 {dimension_numbers = #tpu.dot_dimension_numbers<[1], [0], [0], [1], [0, 0, 1, 1], [], []>} : vector<8x8xf32>, vector<8x256xf32>, vector<8x256xf32> -> vector<8x256xf32>
    %128 = arith.addf %119, %127 : vector<8x256xf32>
    %c241_i32_99 = arith.constant 241 : i32
    %129 = tpu.dynamic_rotate %80 by %c241_i32_99 dim 1 : vector<8x256xf32>, i32 -> vector<8x256xf32>
    %c6_100 = arith.constant 6 : index
    %c0_101 = arith.constant 0 : index
    %c0_102 = arith.constant 0 : index
    %130 = vector.load %arg3[%c6_100, %c0_101, %c0_102] : memref<9x1x256xf32, #tpu.memory_space<vmem>>, vector<1x1x256xf32>
    %131 = vector.shape_cast %130 : vector<1x1x256xf32> to vector<1x256xf32>
    %132 = vector.broadcast %131 : vector<1x256xf32> to vector<8x256xf32>
    %133 = arith.mulf %129, %132 : vector<8x256xf32>
    %c6_103 = arith.constant 6 : index
    %c0_104 = arith.constant 0 : index
    %c0_105 = arith.constant 0 : index
    %134 = vector.load %arg6[%c6_103, %c0_104, %c0_105] : memref<9x8x8xf32, #tpu.memory_space<vmem>>, vector<1x8x8xf32>
    %135 = vector.shape_cast %134 : vector<1x8x8xf32> to vector<8x8xf32>
    %cst_106 = arith.constant dense<0.000000e+00> : vector<8x256xf32>
    %136 = tpu.matmul %135, %133, %cst_106 {dimension_numbers = #tpu.dot_dimension_numbers<[1], [0], [0], [1], [0, 0, 1, 1], [], []>} : vector<8x8xf32>, vector<8x256xf32>, vector<8x256xf32> -> vector<8x256xf32>
    %137 = arith.addf %128, %136 : vector<8x256xf32>
    %c240_i32_107 = arith.constant 240 : i32
    %138 = tpu.dynamic_rotate %80 by %c240_i32_107 dim 1 : vector<8x256xf32>, i32 -> vector<8x256xf32>
    %c7_108 = arith.constant 7 : index
    %c0_109 = arith.constant 0 : index
    %c0_110 = arith.constant 0 : index
    %139 = vector.load %arg3[%c7_108, %c0_109, %c0_110] : memref<9x1x256xf32, #tpu.memory_space<vmem>>, vector<1x1x256xf32>
    %140 = vector.shape_cast %139 : vector<1x1x256xf32> to vector<1x256xf32>
    %141 = vector.broadcast %140 : vector<1x256xf32> to vector<8x256xf32>
    %142 = arith.mulf %138, %141 : vector<8x256xf32>
    %c7_111 = arith.constant 7 : index
    %c0_112 = arith.constant 0 : index
    %c0_113 = arith.constant 0 : index
    %143 = vector.load %arg6[%c7_111, %c0_112, %c0_113] : memref<9x8x8xf32, #tpu.memory_space<vmem>>, vector<1x8x8xf32>
    %144 = vector.shape_cast %143 : vector<1x8x8xf32> to vector<8x8xf32>
    %cst_114 = arith.constant dense<0.000000e+00> : vector<8x256xf32>
    %145 = tpu.matmul %144, %142, %cst_114 {dimension_numbers = #tpu.dot_dimension_numbers<[1], [0], [0], [1], [0, 0, 1, 1], [], []>} : vector<8x8xf32>, vector<8x256xf32>, vector<8x256xf32> -> vector<8x256xf32>
    %146 = arith.addf %137, %145 : vector<8x256xf32>
    %c239_i32_115 = arith.constant 239 : i32
    %147 = tpu.dynamic_rotate %80 by %c239_i32_115 dim 1 : vector<8x256xf32>, i32 -> vector<8x256xf32>
    %c8_116 = arith.constant 8 : index
    %c0_117 = arith.constant 0 : index
    %c0_118 = arith.constant 0 : index
    %148 = vector.load %arg3[%c8_116, %c0_117, %c0_118] : memref<9x1x256xf32, #tpu.memory_space<vmem>>, vector<1x1x256xf32>
    %149 = vector.shape_cast %148 : vector<1x1x256xf32> to vector<1x256xf32>
    %150 = vector.broadcast %149 : vector<1x256xf32> to vector<8x256xf32>
    %151 = arith.mulf %147, %150 : vector<8x256xf32>
    %c8_119 = arith.constant 8 : index
    %c0_120 = arith.constant 0 : index
    %c0_121 = arith.constant 0 : index
    %152 = vector.load %arg6[%c8_119, %c0_120, %c0_121] : memref<9x8x8xf32, #tpu.memory_space<vmem>>, vector<1x8x8xf32>
    %153 = vector.shape_cast %152 : vector<1x8x8xf32> to vector<8x8xf32>
    %cst_122 = arith.constant dense<0.000000e+00> : vector<8x256xf32>
    %154 = tpu.matmul %153, %151, %cst_122 {dimension_numbers = #tpu.dot_dimension_numbers<[1], [0], [0], [1], [0, 0, 1, 1], [], []>} : vector<8x8xf32>, vector<8x256xf32>, vector<8x256xf32> -> vector<8x256xf32>
    %155 = arith.addf %146, %154 : vector<8x256xf32>
    %c0_123 = arith.constant 0 : index
    %c0_124 = arith.constant 0 : index
    %156 = vector.load %arg7[%c0_123, %c0_124] : memref<8x1xf32, #tpu.memory_space<vmem>>, vector<8x1xf32>
    %157 = vector.broadcast %156 : vector<8x1xf32> to vector<8x256xf32>
    %158 = arith.addf %155, %157 : vector<8x256xf32>
    %cst_125 = arith.constant 0.000000e+00 : f32
    %159 = vector.broadcast %cst_125 : f32 to vector<8x256xf32>
    %160 = arith.maximumf %158, %159 : vector<8x256xf32>
    %c0_126 = arith.constant 0 : index
    %c0_127 = arith.constant 0 : index
    %161 = vector.load %arg2[%c0_126, %c0_127] : memref<8x256xf32, #tpu.memory_space<vmem>>, vector<8x256xf32>
    %162 = arith.addf %161, %160 : vector<8x256xf32>
    %c0_128 = arith.constant 0 : index
    %c0_129 = arith.constant 0 : index
    %163 = vector.load %arg8[%c0_128, %c0_129] : memref<1x256xf32, #tpu.memory_space<vmem>>, vector<1x256xf32>
    %c0_130 = arith.constant 0 : index
    %c0_131 = arith.constant 0 : index
    %164 = vector.load %arg9[%c0_130, %c0_131] : memref<1x256xf32, #tpu.memory_space<vmem>>, vector<1x256xf32>
    %cst_132 = arith.constant dense<0.000000e+00> : vector<8xf32>
    %165 = vector.multi_reduction <add>, %162, %cst_132 [1] : vector<8x256xf32> to vector<8xf32>
    %166 = vector.shape_cast %165 : vector<8xf32> to vector<8x1xf32>
    %cst_133 = arith.constant 2.560000e+02 : f32
    %167 = vector.broadcast %cst_133 : f32 to vector<8x1xf32>
    %168 = arith.divf %166, %167 : vector<8x1xf32>
    %169 = vector.broadcast %168 : vector<8x1xf32> to vector<8x256xf32>
    %170 = arith.subf %162, %169 : vector<8x256xf32>
    %171 = arith.mulf %170, %170 : vector<8x256xf32>
    %cst_134 = arith.constant dense<0.000000e+00> : vector<8xf32>
    %172 = vector.multi_reduction <add>, %171, %cst_134 [1] : vector<8x256xf32> to vector<8xf32>
    %173 = vector.shape_cast %172 : vector<8xf32> to vector<8x1xf32>
    %cst_135 = arith.constant 2.560000e+02 : f32
    %174 = vector.broadcast %cst_135 : f32 to vector<8x1xf32>
    %175 = arith.divf %173, %174 : vector<8x1xf32>
    %176 = vector.broadcast %168 : vector<8x1xf32> to vector<8x256xf32>
    %177 = arith.subf %162, %176 : vector<8x256xf32>
    %cst_136 = arith.constant 9.99999974E-6 : f32
    %178 = vector.broadcast %cst_136 : f32 to vector<8x1xf32>
    %179 = arith.addf %175, %178 : vector<8x1xf32>
    %180 = math.rsqrt %179 : vector<8x1xf32>
    %181 = vector.broadcast %180 : vector<8x1xf32> to vector<8x256xf32>
    %182 = arith.mulf %177, %181 : vector<8x256xf32>
    %183 = vector.broadcast %163 : vector<1x256xf32> to vector<8x256xf32>
    %184 = arith.mulf %182, %183 : vector<8x256xf32>
    %185 = vector.broadcast %164 : vector<1x256xf32> to vector<8x256xf32>
    %186 = arith.addf %184, %185 : vector<8x256xf32>
    %c0_137 = arith.constant 0 : index
    %c0_138 = arith.constant 0 : index
    %187 = vector.load %arg10[%c0_137, %c0_138] : memref<256x128xf32, #tpu.memory_space<vmem>>, vector<256x128xf32>
    %cst_139 = arith.constant dense<0.000000e+00> : vector<8x128xf32>
    %188 = tpu.matmul %186, %187, %cst_139 {dimension_numbers = #tpu.dot_dimension_numbers<[1], [0], [0], [1], [0, 0, 1, 1], [], []>} : vector<8x256xf32>, vector<256x128xf32>, vector<8x128xf32> -> vector<8x128xf32>
    %c0_140 = arith.constant 0 : index
    %c0_141 = arith.constant 0 : index
    %189 = vector.load %arg11[%c0_140, %c0_141] : memref<1x128xf32, #tpu.memory_space<vmem>>, vector<1x128xf32>
    %190 = vector.broadcast %189 : vector<1x128xf32> to vector<8x128xf32>
    %191 = arith.addf %188, %190 : vector<8x128xf32>
    %c0_142 = arith.constant 0 : index
    %c0_143 = arith.constant 0 : index
    %192 = vector.load %arg12[%c0_142, %c0_143] : memref<1x128xf32, #tpu.memory_space<vmem>>, vector<1x128xf32>
    %c0_144 = arith.constant 0 : index
    %c0_145 = arith.constant 0 : index
    %193 = vector.load %arg13[%c0_144, %c0_145] : memref<1x128xf32, #tpu.memory_space<vmem>>, vector<1x128xf32>
    %cst_146 = arith.constant dense<0.000000e+00> : vector<8xf32>
    %194 = vector.multi_reduction <add>, %191, %cst_146 [1] : vector<8x128xf32> to vector<8xf32>
    %195 = vector.shape_cast %194 : vector<8xf32> to vector<8x1xf32>
    %cst_147 = arith.constant 1.280000e+02 : f32
    %196 = vector.broadcast %cst_147 : f32 to vector<8x1xf32>
    %197 = arith.divf %195, %196 : vector<8x1xf32>
    %198 = vector.broadcast %197 : vector<8x1xf32> to vector<8x128xf32>
    %199 = arith.subf %191, %198 : vector<8x128xf32>
    %200 = arith.mulf %199, %199 : vector<8x128xf32>
    %cst_148 = arith.constant dense<0.000000e+00> : vector<8xf32>
    %201 = vector.multi_reduction <add>, %200, %cst_148 [1] : vector<8x128xf32> to vector<8xf32>
    %202 = vector.shape_cast %201 : vector<8xf32> to vector<8x1xf32>
    %cst_149 = arith.constant 1.280000e+02 : f32
    %203 = vector.broadcast %cst_149 : f32 to vector<8x1xf32>
    %204 = arith.divf %202, %203 : vector<8x1xf32>
    %205 = vector.broadcast %197 : vector<8x1xf32> to vector<8x128xf32>
    %206 = arith.subf %191, %205 : vector<8x128xf32>
    %cst_150 = arith.constant 9.99999974E-6 : f32
    %207 = vector.broadcast %cst_150 : f32 to vector<8x1xf32>
    %208 = arith.addf %204, %207 : vector<8x1xf32>
    %209 = math.rsqrt %208 : vector<8x1xf32>
    %210 = vector.broadcast %209 : vector<8x1xf32> to vector<8x128xf32>
    %211 = arith.mulf %206, %210 : vector<8x128xf32>
    %212 = vector.broadcast %192 : vector<1x128xf32> to vector<8x128xf32>
    %213 = arith.mulf %211, %212 : vector<8x128xf32>
    %214 = vector.broadcast %193 : vector<1x128xf32> to vector<8x128xf32>
    %215 = arith.addf %213, %214 : vector<8x128xf32>
    %c0_151 = arith.constant 0 : index
    %c0_152 = arith.constant 0 : index
    %216 = vector.load %arg14[%c0_151, %c0_152] : memref<128x32xf32, #tpu.memory_space<vmem>>, vector<128x32xf32>
    %cst_153 = arith.constant dense<0.000000e+00> : vector<8x32xf32>
    %217 = tpu.matmul %215, %216, %cst_153 {dimension_numbers = #tpu.dot_dimension_numbers<[1], [0], [0], [1], [0, 0, 1, 1], [], []>} : vector<8x128xf32>, vector<128x32xf32>, vector<8x32xf32> -> vector<8x32xf32>
    %c0_154 = arith.constant 0 : index
    %c0_155 = arith.constant 0 : index
    %218 = vector.load %arg15[%c0_154, %c0_155] : memref<1x32xf32, #tpu.memory_space<vmem>>, vector<1x32xf32>
    %219 = vector.broadcast %218 : vector<1x32xf32> to vector<8x32xf32>
    %220 = arith.addf %217, %219 : vector<8x32xf32>
    %c0_156 = arith.constant 0 : index
    %c0_157 = arith.constant 0 : index
    %221 = vector.load %arg16[%c0_156, %c0_157] : memref<8x32xf32, #tpu.memory_space<vmem>>, vector<8x32xf32>
    tpu.vector_store %arg16[%c0_156, %c0_157], %220 {strides = array<i32>} : memref<8x32xf32, #tpu.memory_space<vmem>>, vector<8x32xf32>,
    return
  }
  func.func @transform_0(%arg0: i32) -> (i32, i32) {
    %c0_i32 = arith.constant 0 : i32
    %c0_i32_0 = arith.constant 0 : i32
    return %arg0, %c0_i32 : i32, i32
  }
  func.func @transform_1(%arg0: i32) -> (i32, i32) {
    %c0_i32 = arith.constant 0 : i32
    %c0_i32_0 = arith.constant 0 : i32
    return %arg0, %c0_i32 : i32, i32
  }
  func.func @transform_2(%arg0: i32) -> (i32, i32, i32) {
    %c0_i32 = arith.constant 0 : i32
    %c0_i32_0 = arith.constant 0 : i32
    %c0_i32_1 = arith.constant 0 : i32
    %c0_i32_2 = arith.constant 0 : i32
    return %c0_i32, %c0_i32_0, %c0_i32_1 : i32, i32, i32
  }
  func.func @transform_3(%arg0: i32) -> (i32, i32, i32) {
    %c0_i32 = arith.constant 0 : i32
    %c0_i32_0 = arith.constant 0 : i32
    %c0_i32_1 = arith.constant 0 : i32
    %c0_i32_2 = arith.constant 0 : i32
    return %c0_i32, %c0_i32_0, %c0_i32_1 : i32, i32, i32
  }
  func.func @transform_4(%arg0: i32) -> (i32, i32) {
    %c0_i32 = arith.constant 0 : i32
    %c0_i32_0 = arith.constant 0 : i32
    %c0_i32_1 = arith.constant 0 : i32
    return %c0_i32, %c0_i32_0 : i32, i32
  }
  func.func @transform_5(%arg0: i32) -> (i32, i32, i32) {
    %c0_i32 = arith.constant 0 : i32
    %c0_i32_0 = arith.constant 0 : i32
    %c0_i32_1 = arith.constant 0 : i32
    %c0_i32_2 = arith.constant 0 : i32
    return %c0_i32, %c0_i32_0, %c0_i32_1 : i32, i32, i32
  }
  func.func @transform_6(%arg0: i32) -> (i32, i32) {
    %c0_i32 = arith.constant 0 : i32
    %c0_i32_0 = arith.constant 0 : i32
    %c0_i32_1 = arith.constant 0 : i32
    return %c0_i32, %c0_i32_0 : i32, i32
  }
  func.func @transform_7(%arg0: i32) -> (i32, i32) {
    %c0_i32 = arith.constant 0 : i32
    %c0_i32_0 = arith.constant 0 : i32
    %c0_i32_1 = arith.constant 0 : i32
    return %c0_i32, %c0_i32_0 : i32, i32
  }
  func.func @transform_8(%arg0: i32) -> (i32, i32) {
    %c0_i32 = arith.constant 0 : i32
    %c0_i32_0 = arith.constant 0 : i32
    %c0_i32_1 = arith.constant 0 : i32
    return %c0_i32, %c0_i32_0 : i32, i32
  }
  func.func @transform_9(%arg0: i32) -> (i32, i32) {
    %c0_i32 = arith.constant 0 : i32
    %c0_i32_0 = arith.constant 0 : i32
    %c0_i32_1 = arith.constant 0 : i32
    return %c0_i32, %c0_i32_0 : i32, i32
  }
  func.func @transform_10(%arg0: i32) -> (i32, i32) {
    %c0_i32 = arith.constant 0 : i32
    %c0_i32_0 = arith.constant 0 : i32
    %c0_i32_1 = arith.constant 0 : i32
    return %c0_i32, %c0_i32_0 : i32, i32
  }
  func.func @transform_11(%arg0: i32) -> (i32, i32) {
    %c0_i32 = arith.constant 0 : i32
    %c0_i32_0 = arith.constant 0 : i32
    %c0_i32_1 = arith.constant 0 : i32
    return %c0_i32, %c0_i32_0 : i32, i32
  }
  func.func @transform_12(%arg0: i32) -> (i32, i32) {
    %c0_i32 = arith.constant 0 : i32
    %c0_i32_0 = arith.constant 0 : i32
    %c0_i32_1 = arith.constant 0 : i32
    return %c0_i32, %c0_i32_0 : i32, i32
  }
  func.func @transform_13(%arg0: i32) -> (i32, i32) {
    %c0_i32 = arith.constant 0 : i32
    %c0_i32_0 = arith.constant 0 : i32
    %c0_i32_1 = arith.constant 0 : i32
    return %c0_i32, %c0_i32_0 : i32, i32
  }
  func.func @transform_14(%arg0: i32) -> (i32, i32) {
    %c0_i32 = arith.constant 0 : i32
    %c0_i32_0 = arith.constant 0 : i32
    %c0_i32_1 = arith.constant 0 : i32
    return %c0_i32, %c0_i32_0 : i32, i32
  }
  func.func @transform_15(%arg0: i32) -> (i32, i32) {
    %c0_i32 = arith.constant 0 : i32
    %c0_i32_0 = arith.constant 0 : i32
    return %arg0, %c0_i32 : i32, i32
  }
}

</mosaic_0001>

<bundles_post_ra>
// kernel: tpu_custom_call.1
= control target key start
LH: loop header
LB: loop body
LE: loop exit
PB: predicated region body
PF: predicated region fallthrough
CT: control target
= control target key end

     0   :  { %s2749_s0 = inlined_call_operand.vmem [shape: f32[16,256], index: 0, kind: input, shape index: {}]   ;;  %s2750_s1 = inlined_call_operand.vmem [shape: f32[16,256], index: 1, kind: input, shape index: {}]   ;;  %s2751_s2 = inlined_call_operand.vmem [shape: f32[9,1,256], index: 2, kind: input, shape index: {}]   ;;  %s2752_s3 = inlined_call_operand.vmem [shape: f32[9,8,8], index: 3, kind: input, shape index: {}]   ;;  %s2753_s4 = inlined_call_operand.vmem [shape: f32[8,1], index: 4, kind: input, shape index: {}]   ;;  %s2754_s5 = inlined_call_operand.vmem [shape: f32[9,8,8], index: 5, kind: input, shape index: {}]   ;;  %s2755_s6 = inlined_call_operand.vmem [shape: f32[8,1], index: 6, kind: input, shape index: {}]   ;;  %s2756_s7 = inlined_call_operand.vmem [shape: f32[1,256], index: 7, kind: input, shape index: {}]   ;;  %s2757_s8 = inlined_call_operand.vmem [shape: f32[1,256], index: 8, kind: input, shape index: {}]   ;;  %s2758_s9 = inlined_call_operand.vmem [shape: f32[256,128], index: 9, kind: input, shape index: {}]   ;;  %s2759_s10 = inlined_call_operand.vmem [shape: f32[1,128], index: 10, kind: input, shape index: {}]   ;;  %s2760_s11 = inlined_call_operand.vmem [shape: f32[1,128], index: 11, kind: input, shape index: {}]   ;;  %s2761_s12 = inlined_call_operand.vmem [shape: f32[1,128], index: 12, kind: input, shape index: {}]   ;;  %s2762_s13 = inlined_call_operand.vmem [shape: f32[128,32], index: 13, kind: input, shape index: {}]   ;;  %s2763_s14 = inlined_call_operand.vmem [shape: f32[1,32], index: 14, kind: input, shape index: {}]   ;;  %s2764_s15 = inlined_call_operand.hbm [shape: f32[16,32], index: 15, kind: output, shape index: {}]  }
   0x1   :  { %2781 = sst [smem:[#allocation8_spill]] %s2749_s0 }
   0x2   :  { %2782 = sst [smem:[#allocation9_spill]] %s2750_s1 }
   0x3   :  { %2783 = sst [smem:[#allocation10_spill]] %s2751_s2 }
   0x4   :  { %2784 = sst [smem:[#allocation11_spill]] %s2752_s3 }
   0x5   :  { %20 = vsyncpa [#allocation3], 0 }
   0x6   :  { %22 = vsyncpa [#allocation3 + $0x1], 0  ;;  %s2152_s18 = smov 0   ;;  %s2154_s19 = smov 0  }
   0x7   :  { %s2156_s20 = smov 0   ;;  %s2158_s21 = smov 0  }
   0x8 LB: > { %2785 = sst [smem:[#allocation5_spill]] %s2055_s20  ;;  %s2173_s22 = sadd.s32 4294967295, %s2059_s21   ;;  %s2059_s21 = sphi %s2158_s21, %s2801_s21   ;;  %s2055_s20 = sphi %s2156_s20, %s2803_s20   ;;  %s2051_s19 = sphi %s2154_s19, %s2805_s19   ;;  %s2047_s18 = sphi %s2152_s18, %s2804_s18  }
   0x9   : > { %s1859_s23 = sadd.s32 4294967294, %s2059_s21   ;;  %s2177_s24 = sadd.s32 1, %s2059_s21  }
   0xa   : > { %2786 = sst [smem:[#allocation6_spill]] %s2177_s24  ;;  %s360_s25 = sadd.s32 1, %s2055_s20 }
   0xb   : > { %s357_s26 = ssub.s32 %s2059_s21, %s2177_s24  ;;  %p370_p0 = scmp.ne.s32.totalorder %s2055_s20, %s2051_s19 }
   0xc   : > { %p358_p1 = scmp.eq.s32.totalorder %s357_s26, 0  ;;  %p371_p2 = scmp.eq.s32.totalorder %s2173_s22, 1 }
   0xd   : > { %p376_p3 = scmp.ne.s32.totalorder %s2051_s19, %s2047_s18  ;;  %p377_p4 = scmp.eq.s32.totalorder %s1859_s23, 1 }
   0xe   : > { %s2188_s27 = scalar_select %p358_p1, %s2055_s20, %s360_s25  }
   0xf   : > { %p2190_p5 = por %p371_p2, %p370_p0  ;;  %p2194_p6 = por %p377_p4, %p376_p3 }
  0x10   : > { %2787 = sst [smem:[#allocation7_spill]] %s2188_s27  ;;  %p1862_p7 = scmp.ge.s32.totalorder %s2059_s21, 1 }
  0x11   : > { %p450_p8 = scmp.lt.s32.totalorder %s2059_s21, 3 }
  0x13   : > { %p451_p9 = pnand %p1862_p7, %p450_p8 }
  0x14   : > { %p503_p10 = scmp.lt.s32.totalorder (!%p451_p9), %s2173_s22, 1  ;;  %s2790_s0 = sld [smem:[#allocation8_spill]] (!%p451_p9) }
  0x15   : > { %454 = sbr.rel (%p451_p9) target bundleno = 1441 (0x5a1), region = 80  ;;  %s2061_s26 = smov (!%p451_p9), 16  }
  0x16   : > { %s2771_s27 = smov (!%p451_p9), 17   ;;  %s2063_s20 = smov (!%p451_p9), 15  }
  0x17   : > { %s2769_s24 = smov (!%p451_p9), 1   ;;  %s2777_s17 = smov (!%p451_p9), 127  }
  0x18   : > { %s2779_s23 = smov (!%p451_p9), 113   ;;  %s2791_s2 = sld [smem:[#allocation10_spill]] (!%p451_p9) }
  0x19   : > { %s2792_s3 = sld [smem:[#allocation11_spill]] (!%p451_p9) }
  0x1a   : > { %s2202_s30 = scalar_select %p503_p10, %s2173_s22, 1  ;;  %v519_v3 = vlaneseq  ;;  %vm551_vm1 = vcmask 64512   ;;  %v2069_v48 = vmov 0  }
  0x1b   : > { %1983 = vset.pattern.permute.xlu1 %v2069_v48  ;;  %1984 = vset.pattern.permute.xlu0 %v2069_v48  ;;  %s2800_s1 = sld [smem:[#allocation9_spill]] }
  0x1c   : > { %s2768_s16 = sshll.u32 %s2202_s30, 4  ;;  %v2226_v4 = vand.u32 127, %v519_v3 }
  0x1d   : > { %s507_s25 = scalar_lea.vmem %s2790_s0, %s2768_s16  ;;  %s2773_s16 = smov 111  }
  0x1e   : > { %v513_v0 = vld [vmem:[%s507_s25] sm:$0xff]  ;;  %v514_v1 = vld [vmem:[%s507_s25 + $0x8] sm:$0xff]  ;;  %s2775_s25 = smov 112   ;;  %vm642_vm0 = vcmp.lt.s32.totalorder %v2226_v4, 15  ;;  %vm537_vm2 = vcmp.lt.s32.totalorder %v2226_v4, 16  ;;  %vm521_vm3 = vcmp.lt.s32.totalorder %v2226_v4, 17 }
  0x1f   : > { %533 = vrot.lane.b32.xlu0 %v513_v0, %s2061_s26  ;;  %515 = vrot.lane.b32.xlu1 %v513_v0, %s2771_s27  ;;  %v2231_v6 = vld [vmem:[%s2791_s2 + $0x4] sm:$0x3]  ;;  %v1875_v10 = vld [vmem:[%s2792_s3 + $0x10] sm:$0xff]  ;;  %vm705_vm4 = vcmp.lt.s32.totalorder %v2226_v4, 1  ;;  %vm815_vm5 = vcmp.lt.s32.totalorder %v2226_v4, 127  ;;  %vm878_vm6 = vcmp.lt.s32.totalorder %v2226_v4, 113 }
  0x20   : > { %638 = vrot.lane.b32.xlu2 %v513_v0, %s2063_s20  ;;  %v648_v7 = vperm.slane %v2231_v6, 0  ;;  %v649_v12 = vperm.slane %v2231_v6, 1  ;;  %v1882_v13 = vld [vmem:[%s2792_s3 + $0x20] sm:$0xff]  ;;  %v1869_v28 = vld [vmem:[%s2792_s3 + $0x8] sm:$0xff]  ;;  %v2304_v41 = vld [vmem:[%s2792_s3 + $0x18] sm:$0xff]  ;;  %vm941_vm7 = vcmp.lt.s32.totalorder %v2226_v4, 112 }
  0x21   : > { %v2256_v17 = vld [vmem:[%s2791_s2 + $0x2] sm:$0x3]  ;;  %v2261_v18 = vld [vmem:[%s2791_s2] sm:$0x3]  ;;  %v2287_v31 = vld [vmem:[%s2791_s2 + $0x6] sm:$0x3] }
  0x22   : > { %v543_v19 = vperm.slane %v2256_v17, 0  ;;  %v544_v20 = vperm.slane %v2256_v17, 1  ;;  %v526_v21 = vperm.slane %v2261_v18, 0  ;;  %v527_v33 = vperm.slane %v2261_v18, 1  ;;  %v2309_v42 = vld [vmem:[%s2791_s2 + $0xa] sm:$0x3] }
  0x23   : > { %v711_v34 = vperm.slane %v2287_v31, 0  ;;  %v2314_v43 = vld [vmem:[%s2791_s2 + $0xc] sm:$0x3]  ;;  %v712_v44 = vperm.slane %v2287_v31, 1  ;;  %v821_v45 = vperm.slane %v2309_v42, 0  ;;  %v532_v57 = vld [vmem:[%s2792_s3] sm:$0xff] }
  0x24   : > { %v884_v46 = vperm.slane %v2314_v43, 0  ;;  %v885_v50 = vperm.slane %v2314_v43, 1  ;;  %v1886_v59 = vld [vmem:[%s2792_s3 + $0x28] sm:$0xff]  ;;  %v1890_v63 = vld [vmem:[%s2792_s3 + $0x30] sm:$0xff]  ;;  %vm1004_vm8 = vcmp.lt.s32.totalorder %v2226_v4, 111  ;;  %v1555_v17 = vld [vmem:[%s2755_s6] sm:$0xff] }
  0x25   : > { %v2350_v62 = vld [vmem:[%s2791_s2 + $0xe] sm:$0x3]  ;;  %s500_s0 = sand.u32 1, %s2051_s19  }
  0x27   : > { %535 = vrot.lane.b32.xlu0 %v514_v1, %s2061_s26  ;;  %517 = vrot.lane.b32.xlu1 %v514_v1, %s2771_s27  ;;  %s2794_s27 = smov 113  }
  0x28   : > { %640 = vrot.lane.b32.xlu2 %v514_v1, %s2063_s20 }
  0x2f   : > { %703 = vrot.lane.b32.xlu1 %v514_v1, %s2769_s24  ;;  %701 = vrot.lane.b32.xlu0 %v513_v0, %s2769_s24  ;;  %s2793_s24 = smov 17  }
  0x30   : > { %811 = vrot.lane.b32.xlu2 %v513_v0, %s2777_s17 }
  0x37   : > { %874 = vrot.lane.b32.xlu1 %v513_v0, %s2779_s23  ;;  %813 = vrot.lane.b32.xlu0 %v514_v1, %s2777_s17  ;;  %s2797_s17 = smov 112  }
  0x38   : > { %876 = vrot.lane.b32.xlu2 %v514_v1, %s2779_s23 }
  0x3f   : > { %939 = vrot.lane.b32.xlu1 %v514_v1, %s2775_s25  ;;  %937 = vrot.lane.b32.xlu0 %v513_v0, %s2775_s25  ;;  %s2796_s25 = smov 127  }
  0x40   : > { %1000 = vrot.lane.b32.xlu2 %v513_v0, %s2773_s16 }
  0x47   : > { %1002 = vrot.lane.b32.xlu0 %v514_v1, %s2773_s16  ;;  %s2795_s16 = smov 1  }
  0x7a   : > { %v639_v2 = vpop.permute.xlu2 %638 }
  0x82   : > { %v641_v5 = vpop.permute.xlu2 %640 }
  0x83   : > { %v644_v8 = vsel %vm642_vm0, %v641_v5, %v639_v2  ;;  %v643_v11 = vsel %vm642_vm0, %v639_v2, %v641_v5  ;;  %v947_v2 = vperm.slane %v2350_v62, 0 }
  0x84   : > { %v652_v9 = vmul.f32 %v648_v7, %v644_v8  ;;  %v653_v14 = vmul.f32 %v649_v12, %v643_v11 }
  0x86   : > { %674 = vmatpush.msra.mxu0 %v652_v9  ;;  %694 = vmatpush.msra.mxu1 %v653_v14  ;;  %v2379_v14 = vld [vmem:[%s2791_s2 + $0x10] sm:$0x3] }
  0x87   : > { %1876 = vmatmul.msk.f32.vlgmr.msra.gmra.mxu0 %vm551_vm1, %v1875_v10  ;;  %1877 = vmatmul.msk.f32.vlgmr.msra.gmra.mxu1 %vm551_vm1, %v1875_v10 }
  0x88   : > { %784 = vmatpush.msrb.mxu0 %v513_v0  ;;  %804 = vmatpush.msrb.mxu1 %v514_v1  ;;  %v1063_v0 = vld [vmem:[%s2753_s4] sm:$0xff]  ;;  %v822_v1 = vperm.slane %v2309_v42, 1 }
  0x89   : > { %1066 = vperm.xlu1 %1983, %v1063_v0  }
  0x8a   : > { %v812_v32 = vpop.permute.xlu2 %811 }
  0x8f   : > { %1883 = vmatmul.msk.f32.vlgmr.msrb.gmra.mxu0 %vm551_vm1, %v1882_v13  ;;  %1884 = vmatmul.msk.f32.vlgmr.msrb.gmra.mxu1 %vm551_vm1, %v1882_v13  ;;  %v1894_v13 = vld [vmem:[%s2792_s3 + $0x38] sm:$0xff] }
  0x91   : > { %v534_v15 = vpop.permute.xlu0 %533  ;;  %v516_v16 = vpop.permute.xlu1 %515 }
  0x92   : > { %v877_v47 = vpop.permute.xlu2 %876 }
  0x99   : > { %v536_v22 = vpop.permute.xlu0 %535  ;;  %v518_v23 = vpop.permute.xlu1 %517 }
  0x9a   : > { %v538_v24 = vsel %vm537_vm2, %v534_v15, %v536_v22  ;;  %v523_v25 = vsel %vm521_vm3, %v518_v23, %v516_v16  ;;  %v539_v26 = vsel %vm537_vm2, %v536_v22, %v534_v15  ;;  %v522_v35 = vsel %vm521_vm3, %v516_v16, %v518_v23  ;;  %v1001_v16 = vpop.permute.xlu2 %1000 }
  0x9b   : > { %v547_v27 = vmul.f32 %v543_v19, %v539_v26  ;;  %v548_v29 = vmul.f32 %v544_v20, %v538_v24  ;;  %v530_v30 = vmul.f32 %v526_v21, %v523_v25  ;;  %v531_v39 = vmul.f32 %v527_v33, %v522_v35 }
  0x9c   : > { %v948_v15 = vperm.slane %v2350_v62, 1  ;;  %v1010_v22 = vperm.slane %v2379_v14, 0  ;;  %v1011_v23 = vperm.slane %v2379_v14, 1 }
  0x9d   : > { %570 = vmatpush.msra.mxu3 %v547_v27 }
  0x9e   : > { %1870 = vmatmul.msk.f32.vlgmr.msra.gmra.mxu3 %vm551_vm1, %v1869_v28 }
  0x9f   : > { %590 = vmatpush.msrb.mxu3 %v548_v29 }
  0xa1   : > { %613 = vmatpush.msra.mxu3 %v530_v30  ;;  %v704_v36 = vpop.permute.xlu1 %703  ;;  %v702_v37 = vpop.permute.xlu0 %701 }
  0xa2   : > { %v707_v38 = vsel %vm705_vm4, %v704_v36, %v702_v37  ;;  %v706_v49 = vsel %vm705_vm4, %v702_v37, %v704_v36 }
  0xa3   : > { %v715_v40 = vmul.f32 %v711_v34, %v707_v38  ;;  %v716_v56 = vmul.f32 %v712_v44, %v706_v49 }
  0xa5   : > { %737 = vmatpush.msra.mxu2 %v715_v40 }
  0xa6   : > { %1871 = vmatmul.msk.f32.vlgmr.msrb.gmra.mxu3 %vm551_vm1, %v1869_v28  ;;  %1880 = vmatmul.msk.f32.vlgmr.msra.gmra.mxu2 %vm551_vm1, %v2304_v41 }
  0xa7   : > { %633 = vmatpush.msrb.mxu3 %v531_v39 }
  0xa9   : > { %v875_v51 = vpop.permute.xlu1 %874  ;;  %v814_v52 = vpop.permute.xlu0 %813 }
  0xaa   : > { %v816_v53 = vsel %vm815_vm5, %v812_v32, %v814_v52  ;;  %v879_v54 = vsel %vm878_vm6, %v875_v51, %v877_v47  ;;  %v880_v55 = vsel %vm878_vm6, %v877_v47, %v875_v51  ;;  %v817_v3 = vsel %vm815_vm5, %v814_v52, %v812_v32  ;;  %v1898_v32 = vld [vmem:[%s2792_s3 + $0x40] sm:$0xff] }
  0xab   : > { %v825_v58 = vmul.f32 %v821_v45, %v816_v53  ;;  %v888_v60 = vmul.f32 %v884_v46, %v879_v54  ;;  %v889_v61 = vmul.f32 %v885_v50, %v880_v55  ;;  %v826_v10 = vmul.f32 %v822_v1, %v817_v3 }
  0xad   : > { %847 = vmatpush.msrb.mxu2 %v825_v58  ;;  %910 = vmatpush.msra.mxu0 %v888_v60 }
  0xae   : > { %1872 = vmatmul.msk.f32.vlgmr.msra.gmra.mxu3 %vm551_vm1, %v532_v57  ;;  %1887 = vmatmul.msk.f32.vlgmr.msrb.gmra.mxu2 %vm551_vm1, %v1886_v59 }
  0xaf   : > { %1891 = vmatmul.msk.f32.vlgmr.msra.gmra.mxu0 %vm551_vm1, %v1890_v63  ;;  %757 = vmatpush.msra.mxu3 %v716_v56 }
  0xb0   : > { %930 = vmatpush.msra.mxu1 %v889_v61 }
  0xb1   : > { %v940_v5 = vpop.permute.xlu1 %939  ;;  %v938_v8 = vpop.permute.xlu0 %937  ;;  %1892 = vmatmul.msk.f32.vlgmr.msra.gmra.mxu1 %vm551_vm1, %v1890_v63 }
  0xb2   : > { %v942_v9 = vsel %vm941_vm7, %v938_v8, %v940_v5  ;;  %v943_v24 = vsel %vm941_vm7, %v940_v5, %v938_v8 }
  0xb3   : > { %v951_v11 = vmul.f32 %v947_v2, %v942_v9  ;;  %v952_v28 = vmul.f32 %v948_v15, %v943_v24 }
  0xb5   : > { %973 = vmatpush.msra.mxu2 %v951_v11 }
  0xb6   : > { %1873 = vmatmul.msk.f32.vlgmr.msrb.gmra.mxu3 %vm551_vm1, %v532_v57  ;;  %1895 = vmatmul.msk.f32.vlgmr.msra.gmra.mxu2 %vm551_vm1, %v1894_v13 }
  0xb7   : > { %867 = vmatpush.msrb.mxu3 %v826_v10 }
  0xb9   : > { %v1003_v25 = vpop.permute.xlu0 %1002 }
  0xba   : > { %v1005_v26 = vsel %vm1004_vm8, %v1001_v16, %v1003_v25  ;;  %v1006_v27 = vsel %vm1004_vm8, %v1003_v25, %v1001_v16 }
  0xbb   : > { %v1014_v29 = vmul.f32 %v1010_v22, %v1005_v26  ;;  %v1015_v30 = vmul.f32 %v1011_v23, %v1006_v27 }
  0xbd   : > { %1036 = vmatpush.msrb.mxu0 %v1014_v29  ;;  %1056 = vmatpush.msrb.mxu1 %v1015_v30 }
  0xbe   : > { %1881 = vmatmul.msk.f32.vlgmr.msra.gmra.mxu3 %vm551_vm1, %v2304_v41  ;;  %1899 = vmatmul.msk.f32.vlgmr.msrb.gmra.mxu0 %vm551_vm1, %v1898_v32 }
  0xbf   : > { %993 = vmatpush.msra.mxu3 %v952_v28  ;;  %1900 = vmatmul.msk.f32.vlgmr.msrb.gmra.mxu1 %vm551_vm1, %v1898_v32 }
  0xc6   : > { %1888 = vmatmul.msk.f32.vlgmr.msrb.gmra.mxu3 %vm551_vm1, %v1886_v59 }
  0xce   : > { %1896 = vmatmul.msk.f32.vlgmr.msra.gmra.mxu3 %vm551_vm1, %v1894_v13 }
  0xfb   : > { %v1067_v61 = vpop.permute.xlu1 %1066 }
 0x104   : > { %v676_v35 = vpop.f32.mrf.mxu0  ;;  %v696_v51 = vpop.f32.mrf.mxu1 }
 0x10c   : > { %v786_v37 = vpop.f32.mrf.mxu0  ;;  %v806_v59 = vpop.f32.mrf.mxu1 }
 0x121   : > { %v572_v36 = vpop.f32.mrf.mxu3 }
 0x129   : > { %v592_v38 = vpop.f32.mrf.mxu3  ;;  %v739_v39 = vpop.f32.mrf.mxu2 }
 0x12c   : > { %v912_v49 = vpop.f32.mrf.mxu0 }
 0x12e   : > { %v932_v11 = vpop.f32.mrf.mxu1 }
 0x131   : > { %v615_v40 = vpop.f32.mrf.mxu3  ;;  %v849_v47 = vpop.f32.mrf.mxu2 }
 0x132   : > { %v616_v48 = vadd.f32 %v615_v40, %v572_v36 }
 0x134   : > { %v699_v41 = vadd.f32 %v676_v35, %v616_v48 }
 0x136   : > { %v762_v52 = vadd.f32 %v739_v39, %v699_v41 }
 0x138   : > { %v809_v53 = vadd.f32 %v786_v37, %v762_v52 }
 0x139   : > { %v635_v54 = vpop.f32.mrf.mxu3  ;;  %v975_v56 = vpop.f32.mrf.mxu2 }
 0x13a   : > { %v872_v55 = vadd.f32 %v849_v47, %v809_v53  ;;  %v636_v63 = vadd.f32 %v635_v54, %v592_v38  ;;  %v1901_v53 = vld [vmem:[%s2754_s5 + $0x8] sm:$0xff] }
 0x13b   : > { %v1038_v58 = vpop.f32.mrf.mxu0 }
 0x13c   : > { %v935_v57 = vadd.f32 %v912_v49, %v872_v55  ;;  %v700_v8 = vadd.f32 %v696_v51, %v636_v63  ;;  %v1058_v27 = vpop.f32.mrf.mxu1 }
 0x13e   : > { %v998_v60 = vadd.f32 %v975_v56, %v935_v57 }
 0x140   : > { %v1061_v0 = vadd.f32 %v1038_v58, %v998_v60  ;;  %v1081_v60 = vld [vmem:[%s2754_s5] sm:$0xff] }
 0x141   : > { %v759_v3 = vpop.f32.mrf.mxu3 }
 0x142   : > { %v1069_v5 = vadd.f32 %v1067_v61, %v1061_v0  ;;  %v763_v10 = vadd.f32 %v759_v3, %v700_v8  ;;  %v1906_v0 = vld [vmem:[%s2754_s5 + $0x10] sm:$0xff]  ;;  %v1912_v8 = vld [vmem:[%s2754_s5 + $0x20] sm:$0xff] }
 0x144   : > { %v1071_v9 = vmax.f32 %v1069_v5, 0.0  ;;  %v810_v16 = vadd.f32 %v806_v59, %v763_v10  ;;  %v1909_v5 = vld [vmem:[%s2754_s5 + $0x18] sm:$0xff] }
 0x146   : > { %1178 = vrot.lane.b32.xlu1 %v1071_v9, %s2063_s20  ;;  %1082 = vrot.lane.b32.xlu2 %v1071_v9, %s2061_s26 }
 0x149   : > { %v869_v13 = vpop.f32.mrf.mxu3 }
 0x14a   : > { %v873_v24 = vadd.f32 %v869_v13, %v810_v16 }
 0x14c   : > { %v936_v25 = vadd.f32 %v932_v11, %v873_v24 }
 0x151   : > { %v995_v26 = vpop.f32.mrf.mxu3 }
 0x152   : > { %v999_v28 = vadd.f32 %v995_v26, %v936_v25  ;;  %v1915_v25 = vld [vmem:[%s2754_s5 + $0x28] sm:$0xff] }
 0x154   : > { %v1062_v29 = vadd.f32 %v1058_v27, %v999_v28  ;;  %v1918_v28 = vld [vmem:[%s2754_s5 + $0x30] sm:$0xff] }
 0x156   : > { %v1070_v30 = vadd.f32 %v1067_v61, %v1062_v29  ;;  %v1924_v29 = vld [vmem:[%s2754_s5 + $0x40] sm:$0xff] }
 0x158   : > { %v1072_v32 = vmax.f32 %v1070_v30, 0.0 }
 0x15a   : > { %1084 = vrot.lane.b32.xlu0 %v1072_v32, %s2061_s26  ;;  %1075 = vrot.lane.b32.xlu1 %v1072_v32, %s2793_s24  ;;  %s2798_s26 = smov 111  }
 0x15b   : > { %1180 = vrot.lane.b32.xlu2 %v1072_v32, %s2063_s20 }
 0x162   : > { %1073 = vrot.lane.b32.xlu0 %v1071_v9, %s2793_s24  ;;  %1390 = vrot.lane.b32.xlu1 %v1071_v9, %s2794_s27 }
 0x163   : > { %1233 = vrot.lane.b32.xlu2 %v1071_v9, %s2795_s16 }
 0x16a   : > { %1235 = vrot.lane.b32.xlu0 %v1072_v32, %s2795_s16  ;;  %1337 = vrot.lane.b32.xlu1 %v1072_v32, %s2796_s25  ;;  %s2799_s16 = sshll.u32 %s2202_s30, 4 }
 0x16b   : > { %1392 = vrot.lane.b32.xlu2 %v1072_v32, %s2794_s27 }
 0x172   : > { %1335 = vrot.lane.b32.xlu0 %v1071_v9, %s2796_s25  ;;  %1445 = vrot.lane.b32.xlu1 %v1071_v9, %s2797_s17 }
 0x173   : > { %1500 = vrot.lane.b32.xlu2 %v1071_v9, %s2798_s26 }
 0x17a   : > { %1502 = vrot.lane.b32.xlu0 %v1072_v32, %s2798_s26  ;;  %s512_s26 = scalar_lea.vmem %s2800_s1, %s2799_s16  ;;  %s1773_s16 = scalar_lea.sflag [#allocation3], %s500_s0 }
 0x17b   : > { %1447 = vrot.lane.b32.xlu2 %v1072_v32, %s2797_s17  ;;  %s1863_s17 = sshll.u32 %s500_s0, 3 }
 0x17c   : > { %s502_s24 = scalar_lea.vmem [#allocation2], %s1863_s17  ;;  %s2017_s17 = scalar_lea.hbm %s2764_s15, 16 }
 0x17d   : > { %s1785_s27 = sshll.u32 %s502_s24, 4  ;;  %s1786_s27 = int_to_ptr.vmem [resolvable:$true] %s1785_s27 }
 0x182   : > { %1558 = vperm.xlu0 %1984, %v1555_v17  }
 0x1a0   : > { %v1083_v35 = vpop.permute.xlu2 %1082 }
 0x1b5   : > { %v1181_v36 = vpop.permute.xlu2 %1180 }
 0x1b8   : > { %v1179_v37 = vpop.permute.xlu1 %1178 }
 0x1b9   : > { %v1182_v47 = vsel %vm642_vm0, %v1179_v37, %v1181_v36  ;;  %v1183_v48 = vsel %vm642_vm0, %v1181_v36, %v1179_v37 }
 0x1ba   : > { %v1184_v55 = vmul.f32 %v1183_v48, %v648_v7  ;;  %v1185_v56 = vmul.f32 %v1182_v47, %v649_v12 }
 0x1bd   : > { %v1234_v38 = vpop.permute.xlu2 %1233 }
 0x1c5   : > { %v1393_v54 = vpop.permute.xlu2 %1392 }
 0x1cc   : > { %v1085_v39 = vpop.permute.xlu0 %1084  ;;  %v1076_v40 = vpop.permute.xlu1 %1075 }
 0x1cd   : > { %v1086_v49 = vsel %vm537_vm2, %v1083_v35, %v1085_v39  ;;  %v1087_v51 = vsel %vm537_vm2, %v1085_v39, %v1083_v35 }
 0x1ce   : > { %v1088_v41 = vmul.f32 %v1087_v51, %v543_v19  ;;  %v1089_v52 = vmul.f32 %v1086_v49, %v544_v20 }
 0x1d0   : > { %1110 = vmatpush.msrb.mxu2 %v1088_v41  ;;  %1130 = vmatpush.msrb.mxu3 %v1089_v52 }
 0x1d1   : > { %1902 = vmatmul.msk.f32.vlgmr.msrb.gmra.mxu2 %vm551_vm1, %v1901_v53  ;;  %1903 = vmatmul.msk.f32.vlgmr.msrb.gmra.mxu3 %vm551_vm1, %v1901_v53 }
 0x1d2   : > { %1206 = vmatpush.msra.mxu2 %v1184_v55  ;;  %1226 = vmatpush.msra.mxu3 %v1185_v56 }
 0x1d4   : > { %1308 = vmatpush.msrb.mxu2 %v1071_v9  ;;  %1328 = vmatpush.msrb.mxu3 %v1072_v32  ;;  %v1074_v19 = vpop.permute.xlu0 %1073  ;;  %v1391_v20 = vpop.permute.xlu1 %1390 }
 0x1d5   : > { %v1077_v6 = vsel %vm521_vm3, %v1074_v19, %v1076_v40  ;;  %v1078_v7 = vsel %vm521_vm3, %v1076_v40, %v1074_v19  ;;  %v1394_v12 = vsel %vm878_vm6, %v1391_v20, %v1393_v54  ;;  %v1395_v57 = vsel %vm878_vm6, %v1393_v54, %v1391_v20 }
 0x1d6   : > { %v1079_v58 = vmul.f32 %v1078_v7, %v526_v21  ;;  %v1080_v59 = vmul.f32 %v1077_v6, %v527_v33  ;;  %v1396_v61 = vmul.f32 %v1394_v12, %v884_v46  ;;  %v1397_v63 = vmul.f32 %v1395_v57, %v885_v50  ;;  %v1501_v21 = vpop.permute.xlu2 %1500 }
 0x1d8   : > { %1153 = vmatpush.msra.mxu0 %v1079_v58  ;;  %1173 = vmatpush.msra.mxu1 %v1080_v59 }
 0x1d9   : > { %1904 = vmatmul.msk.f32.vlgmr.msra.gmra.mxu0 %vm551_vm1, %v1081_v60  ;;  %1905 = vmatmul.msk.f32.vlgmr.msra.gmra.mxu1 %vm551_vm1, %v1081_v60 }
 0x1da   : > { %1907 = vmatmul.msk.f32.vlgmr.msra.gmra.mxu2 %vm551_vm1, %v1906_v0  ;;  %1908 = vmatmul.msk.f32.vlgmr.msra.gmra.mxu3 %vm551_vm1, %v1906_v0 }
 0x1db   : > { %1418 = vmatpush.msra.mxu2 %v1396_v61  ;;  %1438 = vmatpush.msra.mxu3 %v1397_v63 }
 0x1dc   : > { %v1236_v18 = vpop.permute.xlu0 %1235  ;;  %v1338_v33 = vpop.permute.xlu1 %1337 }
 0x1dd   : > { %v1237_v43 = vsel %vm705_vm4, %v1234_v38, %v1236_v18  ;;  %v1238_v46 = vsel %vm705_vm4, %v1236_v18, %v1234_v38 }
 0x1de   : > { %v1239_v50 = vmul.f32 %v1238_v46, %v711_v34  ;;  %v1240_v3 = vmul.f32 %v1237_v43, %v712_v44  ;;  %v1448_v31 = vpop.permute.xlu2 %1447  ;;  %v1566_v43 = vld [vmem:[%s512_s26 + $0x8] sm:$0xff] }
 0x1e0   : > { %1261 = vmatpush.msrb.mxu0 %v1239_v50  ;;  %1281 = vmatpush.msrb.mxu1 %v1240_v3 }
 0x1e1   : > { %1910 = vmatmul.msk.f32.vlgmr.msrb.gmra.mxu0 %vm551_vm1, %v1909_v5  ;;  %1911 = vmatmul.msk.f32.vlgmr.msrb.gmra.mxu1 %vm551_vm1, %v1909_v5 }
 0x1e2   : > { %1913 = vmatmul.msk.f32.vlgmr.msrb.gmra.mxu2 %vm551_vm1, %v1912_v8  ;;  %1914 = vmatmul.msk.f32.vlgmr.msrb.gmra.mxu3 %vm551_vm1, %v1912_v8 }
 0x1e4   : > { %v1336_v34 = vpop.permute.xlu0 %1335  ;;  %v1446_v44 = vpop.permute.xlu1 %1445 }
 0x1e5   : > { %v1339_v9 = vsel %vm815_vm5, %v1336_v34, %v1338_v33  ;;  %v1340_v10 = vsel %vm815_vm5, %v1338_v33, %v1336_v34  ;;  %v1449_v11 = vsel %vm941_vm7, %v1446_v44, %v1448_v31  ;;  %v1450_v13 = vsel %vm941_vm7, %v1448_v31, %v1446_v44  ;;  %v1565_v33 = vld [vmem:[%s512_s26] sm:$0xff]  ;;  %v1632_v34 = vld [vmem:[%s2758_s9 + $0x78] sm:$0xff]  ;;  %s1928_s26 = sshll.u32 %s2173_s22, 3 }
 0x1e6   : > { %v1341_v16 = vmul.f32 %v1339_v9, %v821_v45  ;;  %v1342_v24 = vmul.f32 %v1340_v10, %v822_v1  ;;  %v1451_v26 = vmul.f32 %v1449_v11, %v947_v2  ;;  %v1452_v27 = vmul.f32 %v1450_v13, %v948_v15  ;;  %v1921_v15 = vld [vmem:[%s2754_s5 + $0x38] sm:$0xff]  ;;  %v1631_v9 = vld [vmem:[%s2758_s9 + $0x70] sm:$0xff]  ;;  %s1783_s30 = scalar_lea.hbm %s2764_s15, %s1928_s26 }
 0x1e7   : > { %v2070_v31 = vmov 256.0   ;;  %v1648_v44 = vld [vmem:[%s2758_s9 + $0xf8] sm:$0xff]  ;;  %v1647_v10 = vld [vmem:[%s2758_s9 + $0xf0] sm:$0xff]  ;;  %s1787_s3 = sshll.u32 %s1783_s30, 4  ;;  %s1788_s3 = int_to_ptr.hbm [resolvable:$true] %s1787_s3 }
 0x1e8   : > { %1363 = vmatpush.msra.mxu0 %v1341_v16  ;;  %1383 = vmatpush.msra.mxu1 %v1342_v24  ;;  %1989 = vrcp.f32 %v2070_v31  ;;  %s2011_s22 = sshra.s32 %s1788_s3, 4  ;;  %s2012_s22 = int_to_ptr.hbm [resolvable:$true] %s2011_s22 }
 0x1e9   : > { %1916 = vmatmul.msk.f32.vlgmr.msra.gmra.mxu0 %vm551_vm1, %v1915_v25  ;;  %1917 = vmatmul.msk.f32.vlgmr.msra.gmra.mxu1 %vm551_vm1, %v1915_v25  ;;  %s2013_s25 = scalar_lea.hbm %s2012_s22, 8  ;;  %p2018_p0 = scmp.lt.s32.totalorder %s2012_s22, %s2764_s15 }
 0x1ea   : > { %1919 = vmatmul.msk.f32.vlgmr.msra.gmra.mxu2 %vm551_vm1, %v1918_v28  ;;  %1920 = vmatmul.msk.f32.vlgmr.msra.gmra.mxu3 %vm551_vm1, %v1918_v28  ;;  %p2014_p11 = scmp.ne.s32.totalorder %s2012_s22, %s2013_s25  ;;  %p2019_p1 = scmp.lt.s32.totalorder %s2017_s17, %s2013_s25 }
 0x1eb   : > { %1473 = vmatpush.msrb.mxu0 %v1451_v26  ;;  %1493 = vmatpush.msrb.mxu1 %v1452_v27 }
 0x1ec   : > { %v1503_v42 = vpop.permute.xlu0 %1502  ;;  %p2015_p12 = pnand %p2014_p11, %p2190_p5  ;;  %p2020_p2 = por %p2019_p1, %p2018_p0 }
 0x1ed   : > { %v1504_v45 = vsel %vm1004_vm8, %v1501_v21, %v1503_v42  ;;  %v1505_v62 = vsel %vm1004_vm8, %v1503_v42, %v1501_v21  ;;  %1653 = vmatpush.msra.mxu0 %v1632_v34  ;;  %1673 = vmatpush.msra.mxu1 %v1648_v44 }
 0x1ee   : > { %v1506_v1 = vmul.f32 %v1504_v45, %v1010_v22  ;;  %v1507_v2 = vmul.f32 %v1505_v62, %v1011_v23  ;;  %v1990_v11 = vpop.eup %1989  ;;  %p2016_p13 = pneg %p2015_p12 }
 0x1ef   : > { %1654 = vmatpush.msra.mxu0 %v1631_v9  ;;  %1674 = vmatpush.msra.mxu1 %v1647_v10  ;;  %v1575_v13 = vmul.f32 256.0, %v1990_v11  ;;  %vm1579_vm9 = vweird.f32 %v1990_v11  ;;  %v1985_v10 = vld [vmem:[%s2759_s10] ss:$0 sm:$0xff] }
 0x1f0   : > { %1528 = vmatpush.msrb.mxu2 %v1506_v1  ;;  %1548 = vmatpush.msrb.mxu3 %v1507_v2  ;;  %p2021_p3 = pnand %p2020_p2, %p2016_p13 }
 0x1f1   : > { %1922 = vmatmul.msk.f32.vlgmr.msrb.gmra.mxu0 %vm551_vm1, %v1921_v15  ;;  %1923 = vmatmul.msk.f32.vlgmr.msrb.gmra.mxu1 %vm551_vm1, %v1921_v15  ;;  %v1576_v16 = vsub.f32 1.0, %v1575_v13  ;;  %v1630_v15 = vld [vmem:[%s2758_s9 + $0x68] sm:$0xff] }
 0x1f2   : > { %1925 = vmatmul.msk.f32.vlgmr.msrb.gmra.mxu2 %vm551_vm1, %v1924_v29  ;;  %1926 = vmatmul.msk.f32.vlgmr.msrb.gmra.mxu3 %vm551_vm1, %v1924_v29  ;;  %v1646_v29 = vld [vmem:[%s2758_s9 + $0xe8] sm:$0xff]  ;;  %vm1770_vm1 = vcmask 261120  }
 0x1f3   : > { %v1577_v24 = vmul.f32 %v1990_v11, %v1576_v16  ;;  %1655 = vmatpush.msra.mxu0 %v1630_v15  ;;  %1675 = vmatpush.msra.mxu1 %v1646_v29 }
 0x1f4   : > { %v1559_v59 = vpop.permute.xlu0 %1558 }
 0x1f5   : > { %v1578_v25 = vadd.f32 %v1990_v11, %v1577_v24 }
 0x1f7   : > { %v2553_v26 = vsel %vm1579_vm9, %v1990_v11, %v1578_v25  ;;  %v2071_v25 = vmov 128.0  }
 0x254   : > { %v1112_v4 = vpop.f32.mrf.mxu2  ;;  %v1132_v14 = vpop.f32.mrf.mxu3 }
 0x256   : > { %v1155_v22 = vpop.f32.mrf.mxu0  ;;  %v1175_v23 = vpop.f32.mrf.mxu1 }
 0x257   : > { %v1156_v37 = vadd.f32 %v1155_v22, %v1112_v4  ;;  %v1176_v38 = vadd.f32 %v1175_v23, %v1132_v14  ;;  %v1629_v4 = vld [vmem:[%s2758_s9 + $0x60] sm:$0xff]  ;;  %v1628_v22 = vld [vmem:[%s2758_s9 + $0x58] sm:$0xff] }
 0x258   : > { %v1645_v14 = vld [vmem:[%s2758_s9 + $0xe0] sm:$0xff]  ;;  %1656 = vmatpush.msra.mxu0 %v1629_v4  ;;  %v1644_v23 = vld [vmem:[%s2758_s9 + $0xd8] sm:$0xff] }
 0x259   : > { %1676 = vmatpush.msra.mxu1 %v1645_v14 }
 0x25a   : > { %1657 = vmatpush.msra.mxu0 %v1628_v22  ;;  %v1743_v22 = vld [vmem:[%s2762_s13 + $0x68] sm:$0xff] }
 0x25b   : > { %1677 = vmatpush.msra.mxu1 %v1644_v23  ;;  %v1742_v23 = vld [vmem:[%s2762_s13 + $0x60] sm:$0xff] }
 0x25d   : > { %v1208_v30 = vpop.f32.mrf.mxu2  ;;  %v1228_v32 = vpop.f32.mrf.mxu3 }
 0x25e   : > { %v1263_v35 = vpop.f32.mrf.mxu0  ;;  %v1283_v36 = vpop.f32.mrf.mxu1  ;;  %v1231_v39 = vadd.f32 %v1208_v30, %v1156_v37  ;;  %v1232_v40 = vadd.f32 %v1228_v32, %v1176_v38  ;;  %v1627_v30 = vld [vmem:[%s2758_s9 + $0x50] sm:$0xff]  ;;  %v1625_v37 = vld [vmem:[%s2758_s9 + $0x40] sm:$0xff] }
 0x25f   : > { %v1643_v32 = vld [vmem:[%s2758_s9 + $0xd0] sm:$0xff]  ;;  %1658 = vmatpush.msra.mxu0 %v1627_v30  ;;  %v1641_v38 = vld [vmem:[%s2758_s9 + $0xc0] sm:$0xff]  ;;  %v1741_v30 = vld [vmem:[%s2762_s13 + $0x58] sm:$0xff] }
 0x260   : > { %v1286_v41 = vadd.f32 %v1263_v35, %v1231_v39  ;;  %v1287_v52 = vadd.f32 %v1283_v36, %v1232_v40  ;;  %1678 = vmatpush.msra.mxu1 %v1643_v32  ;;  %v1626_v35 = vld [vmem:[%s2758_s9 + $0x48] sm:$0xff]  ;;  %v1624_v39 = vld [vmem:[%s2758_s9 + $0x38] sm:$0xff]  ;;  %v1740_v32 = vld [vmem:[%s2762_s13 + $0x50] sm:$0xff] }
 0x261   : > { %v1642_v36 = vld [vmem:[%s2758_s9 + $0xc8] sm:$0xff]  ;;  %1659 = vmatpush.msra.mxu0 %v1626_v35  ;;  %v1640_v40 = vld [vmem:[%s2758_s9 + $0xb8] sm:$0xff] }
 0x262   : > { %1679 = vmatpush.msra.mxu1 %v1642_v36  ;;  %v1739_v35 = vld [vmem:[%s2762_s13 + $0x48] sm:$0xff]  ;;  %v1738_v36 = vld [vmem:[%s2762_s13 + $0x40] sm:$0xff] }
 0x263   : > { %1660 = vmatpush.msra.mxu0 %v1625_v37  ;;  %v1737_v37 = vld [vmem:[%s2762_s13 + $0x38] sm:$0xff] }
 0x264   : > { %1680 = vmatpush.msra.mxu1 %v1641_v38  ;;  %v1736_v38 = vld [vmem:[%s2762_s13 + $0x30] sm:$0xff] }
 0x265   : > { %v1310_v47 = vpop.f32.mrf.mxu2  ;;  %v1330_v48 = vpop.f32.mrf.mxu3  ;;  %1661 = vmatpush.msra.mxu0 %v1624_v39  ;;  %v1735_v39 = vld [vmem:[%s2762_s13 + $0x28] sm:$0xff] }
 0x266   : > { %v1365_v49 = vpop.f32.mrf.mxu0  ;;  %v1385_v51 = vpop.f32.mrf.mxu1  ;;  %v1333_v53 = vadd.f32 %v1310_v47, %v1286_v41  ;;  %v1334_v54 = vadd.f32 %v1330_v48, %v1287_v52  ;;  %1681 = vmatpush.msra.mxu1 %v1640_v40  ;;  %v1623_v47 = vld [vmem:[%s2758_s9 + $0x30] sm:$0xff]  ;;  %v1621_v41 = vld [vmem:[%s2758_s9 + $0x20] sm:$0xff] }
 0x267   : > { %v1639_v48 = vld [vmem:[%s2758_s9 + $0xb0] sm:$0xff]  ;;  %1662 = vmatpush.msra.mxu0 %v1623_v47  ;;  %v1637_v52 = vld [vmem:[%s2758_s9 + $0xa0] sm:$0xff]  ;;  %v1733_v47 = vld [vmem:[%s2762_s13 + $0x18] sm:$0xff] }
 0x268   : > { %v1388_v17 = vadd.f32 %v1365_v49, %v1333_v53  ;;  %v1389_v19 = vadd.f32 %v1385_v51, %v1334_v54  ;;  %1682 = vmatpush.msra.mxu1 %v1639_v48  ;;  %v1622_v49 = vld [vmem:[%s2758_s9 + $0x28] sm:$0xff]  ;;  %v1620_v53 = vld [vmem:[%s2758_s9 + $0x18] sm:$0xff]  ;;  %v1734_v40 = vld [vmem:[%s2762_s13 + $0x20] sm:$0xff] }
 0x269   : > { %v1638_v51 = vld [vmem:[%s2758_s9 + $0xa8] sm:$0xff]  ;;  %1663 = vmatpush.msra.mxu0 %v1622_v49  ;;  %v1636_v54 = vld [vmem:[%s2758_s9 + $0x98] sm:$0xff]  ;;  %v1732_v48 = vld [vmem:[%s2762_s13 + $0x10] sm:$0xff] }
 0x26a   : > { %1683 = vmatpush.msra.mxu1 %v1638_v51  ;;  %v1731_v49 = vld [vmem:[%s2762_s13 + $0x8] sm:$0xff]  ;;  %v1730_v51 = vld [vmem:[%s2762_s13] sm:$0xff] }
 0x26b   : > { %1664 = vmatpush.msra.mxu0 %v1621_v41 }
 0x26c   : > { %1684 = vmatpush.msra.mxu1 %v1637_v52 }
 0x26d   : > { %v1420_v55 = vpop.f32.mrf.mxu2  ;;  %v1440_v56 = vpop.f32.mrf.mxu3  ;;  %1665 = vmatpush.msra.mxu0 %v1620_v53 }
 0x26e   : > { %v1443_v20 = vadd.f32 %v1420_v55, %v1388_v17  ;;  %v1444_v6 = vadd.f32 %v1440_v56, %v1389_v19  ;;  %v1475_v7 = vpop.f32.mrf.mxu0  ;;  %v1495_v12 = vpop.f32.mrf.mxu1  ;;  %1685 = vmatpush.msra.mxu1 %v1636_v54  ;;  %v1619_v55 = vld [vmem:[%s2758_s9 + $0x10] sm:$0xff]  ;;  %v1618_v17 = vld [vmem:[%s2758_s9 + $0x8] sm:$0xff] }
 0x26f   : > { %v1635_v56 = vld [vmem:[%s2758_s9 + $0x90] sm:$0xff]  ;;  %v1634_v19 = vld [vmem:[%s2758_s9 + $0x88] sm:$0xff]  ;;  %1666 = vmatpush.msra.mxu0 %v1619_v55 }
 0x270   : > { %v1498_v57 = vadd.f32 %v1475_v7, %v1443_v20  ;;  %v1499_v58 = vadd.f32 %v1495_v12, %v1444_v6  ;;  %1686 = vmatpush.msra.mxu1 %v1635_v56  ;;  %v1617_v20 = vld [vmem:[%s2758_s9] sm:$0xff] }
 0x271   : > { %v1633_v6 = vld [vmem:[%s2758_s9 + $0x80] sm:$0xff]  ;;  %1667 = vmatpush.msra.mxu0 %v1618_v17 }
 0x272   : > { %1687 = vmatpush.msra.mxu1 %v1634_v19 }
 0x273   : > { %1668 = vmatpush.msra.mxu0 %v1617_v20 }
 0x274   : > { %1688 = vmatpush.msra.mxu1 %v1633_v6  ;;  %v1986_v6 = vld [vmem:[%s2760_s11] ss:$0 sm:$0xff] }
 0x275   : > { %v1530_v60 = vpop.f32.mrf.mxu2  ;;  %v1550_v61 = vpop.f32.mrf.mxu3 }
 0x276   : > { %v1553_v63 = vadd.f32 %v1530_v60, %v1498_v57  ;;  %v1554_v0 = vadd.f32 %v1550_v61, %v1499_v58 }
 0x278   : > { %v1561_v21 = vadd.f32 %v1559_v59, %v1553_v63  ;;  %v1562_v18 = vadd.f32 %v1559_v59, %v1554_v0  ;;  %v1569_v0 = vld [vmem:[%s2756_s7] sm:$0x3] }
 0x27a   : > { %v1563_v46 = vmax.f32 %v1561_v21, 0.0  ;;  %v1564_v50 = vmax.f32 %v1562_v18, 0.0  ;;  %v1570_v18 = vld [vmem:[%s2757_s8] sm:$0x3] }
 0x27c   : > { %v1567_v3 = vadd.f32 %v1565_v33, %v1563_v46  ;;  %v1568_v5 = vadd.f32 %v1566_v43, %v1564_v50  ;;  %v1604_v33 = vperm.slane %v1569_v0, 0  ;;  %v1605_v43 = vperm.slane %v1569_v0, 1 }
 0x27e   : > { %v1571_v8 = vadd.f32 %v1568_v5, %v1567_v3 }
 0x280   : > { %1572 = vadd.xlane.f32.xlu1 %v1571_v8  ;;  %v1612_v8 = vperm.slane %v1570_v18, 1 }
 0x2f3   : > { %v1573_v27 = vpop.xlane.xlu1 %1572 }
 0x2f4   : > { %v1581_v28 = vmul.f32 %v2553_v26, %v1573_v27  ;;  %v1744_v27 = vld [vmem:[%s2762_s13 + $0x70] sm:$0xff] }
 0x2f6   : > { %v2556_v42 = vsub.f32 %v1567_v3, %v1581_v28  ;;  %v2558_v45 = vsub.f32 %v1568_v5, %v1581_v28  ;;  %v1611_v5 = vperm.slane %v1570_v18, 0 }
 0x2f8   : > { %v1584_v62 = vmul.f32 %v2556_v42, %v2556_v42  ;;  %v1585_v1 = vmul.f32 %v2558_v45, %v2558_v45 }
 0x2fa   : > { %v1586_v2 = vadd.f32 %v1585_v1, %v1584_v62 }
 0x2fc   : > { %1587 = vadd.xlane.f32.xlu2 %v1586_v2 }
 0x36f   : > { %v1588_v7 = vpop.xlane.xlu2 %1587 }
 0x370   : > { %v1589_v12 = vmul.f32 %v1588_v7, %v2553_v26  ;;  %v1745_v26 = vld [vmem:[%s2762_s13 + $0x78] sm:$0xff] }
 0x371   : > { %1750 = vmatpush.msra.mxu2 %v1745_v26 }
 0x372   : > { %v1590_v57 = vadd.f32 1e-05, %v1589_v12 }
 0x373   : > { %1751 = vmatpush.msra.mxu2 %v1744_v27 }
 0x374   : > { %1991 = vrsqrt.f32 %v1590_v57  ;;  %vm1597_vm11 = vweird.f32 %v1590_v57 }
 0x375   : > { %1993 = vrcp.f32 %v2071_v25  ;;  %1752 = vmatpush.msra.mxu2 %v1743_v22 }
 0x377   : > { %1753 = vmatpush.msra.mxu2 %v1742_v23 }
 0x379   : > { %1754 = vmatpush.msra.mxu2 %v1741_v30 }
 0x37a   : > { %v1992_v58 = vpop.eup %1991 }
 0x37b   : > { %v1592_v59 = vmul.f32 %v1992_v58, %v1590_v57  ;;  %vm1598_vm10 = vweird.f32 %v1992_v58  ;;  %v1994_v28 = vpop.eup %1993  ;;  %1755 = vmatpush.msra.mxu2 %v1740_v32  ;;  %v1987_v57 = vld [vmem:[%s2761_s12] ss:$0 sm:$0xff] }
 0x37c   : > { %vm1599_vm12 = vmor %vm1597_vm11, %vm1598_vm10  ;;  %vm1702_vm13 = vweird.f32 %v1994_v28 }
 0x37d   : > { %v1593_v60 = vmul.f32 %v1992_v58, %v1592_v59  ;;  %1756 = vmatpush.msra.mxu2 %v1739_v35 }
 0x37f   : > { %v1594_v61 = vmul.f32 0.5, %v1593_v60  ;;  %1757 = vmatpush.msra.mxu2 %v1738_v36  ;;  %v1988_v60 = vld [vmem:[%s2763_s14] ss:$0 sm:$0xff] }
 0x381   : > { %v1595_v63 = vsub.f32 1.5, %v1594_v61  ;;  %1758 = vmatpush.msra.mxu2 %v1737_v37 }
 0x383   : > { %v1596_v21 = vmul.f32 %v1992_v58, %v1595_v63  ;;  %1759 = vmatpush.msra.mxu2 %v1736_v38 }
 0x385   : > { %v1600_v46 = vsel %vm1599_vm12, %v1992_v58, %v1596_v21  ;;  %1760 = vmatpush.msra.mxu2 %v1735_v39 }
 0x386   : > { %v1601_v50 = vmul.f32 %v1600_v46, %v2556_v42  ;;  %v1602_v3 = vmul.f32 %v1600_v46, %v2558_v45  ;;  %v1698_v42 = vmul.f32 128.0, %v1994_v28 }
 0x387   : > { %1761 = vmatpush.msra.mxu2 %v1734_v40 }
 0x388   : > { %v1608_v31 = vmul.f32 %v1604_v33, %v1601_v50  ;;  %v1609_v34 = vmul.f32 %v1605_v43, %v1602_v3  ;;  %v1699_v45 = vsub.f32 1.0, %v1698_v42 }
 0x389   : > { %1762 = vmatpush.msra.mxu2 %v1733_v47 }
 0x38a   : > { %v1615_v44 = vadd.f32 %v1611_v5, %v1608_v31  ;;  %v1616_v9 = vadd.f32 %v1612_v8, %v1609_v34  ;;  %v1700_v62 = vmul.f32 %v1994_v28, %v1699_v45 }
 0x38b   : > { %1763 = vmatpush.msra.mxu2 %v1732_v48 }
 0x38c   : > { %1669 = vmatmul.f32.vlgmr.msra.gmra.mxu0 %v1615_v44  ;;  %1689 = vmatmul.f32.vlgmr.msra.gmra.mxu1 %v1616_v9  ;;  %v1701_v1 = vadd.f32 %v1994_v28, %v1700_v62 }
 0x38d   : > { %1764 = vmatpush.msra.mxu2 %v1731_v49 }
 0x38e   : > { %v1703_v2 = vsel %vm1702_vm13, %v1994_v28, %v1701_v1 }
 0x38f   : > { %1765 = vmatpush.msra.mxu2 %v1730_v51 }
 0x409   : > { %v1670_v11 = vpop.f32.mrf.mxu0  ;;  %v1690_v16 = vpop.f32.mrf.mxu1 }
 0x40a   : > { %v1671_v13 = vadd.f32 %v1985_v10, %v1670_v11 }
 0x40c   : > { %v1691_v24 = vadd.f32 %v1690_v16, %v1671_v13 }
 0x40e   : > { %1695 = vadd.xlane.f32.xlu0 %v1691_v24 }
 0x481   : > { %v1696_v15 = vpop.xlane.xlu0 %1695 }
 0x482   : > { %v1704_v29 = vmul.f32 %v1703_v2, %v1696_v15 }
 0x484   : > { %v1705_v4 = vsub.f32 %v1691_v24, %v1704_v29 }
 0x486   : > { %v1706_v14 = vmul.f32 %v1705_v4, %v1705_v4 }
 0x488   : > { %1707 = vadd.xlane.f32.xlu2 %v1706_v14 }
 0x4fb   : > { %v1708_v41 = vpop.xlane.xlu2 %1707 }
 0x4fc   : > { %v1709_v52 = vmul.f32 %v1708_v41, %v1703_v2 }
 0x4fe   : > { %v1710_v53 = vadd.f32 1e-05, %v1709_v52 }
 0x500   : > { %1995 = vrsqrt.f32 %v1710_v53  ;;  %vm1717_vm15 = vweird.f32 %v1710_v53 }
 0x506   : > { %v1996_v54 = vpop.eup %1995 }
 0x507   : > { %v1712_v55 = vmul.f32 %v1996_v54, %v1710_v53  ;;  %vm1718_vm14 = vweird.f32 %v1996_v54 }
 0x508   : > { %vm1719_vm0 = vmor %vm1717_vm15, %vm1718_vm14 }
 0x509   : > { %v1713_v56 = vmul.f32 %v1996_v54, %v1712_v55 }
 0x50b   : > { %v1714_v17 = vmul.f32 0.5, %v1713_v56 }
 0x50d   : > { %v1715_v19 = vsub.f32 1.5, %v1714_v17 }
 0x50f   : > { %v1716_v20 = vmul.f32 %v1996_v54, %v1715_v19 }
 0x511   : > { %v1720_v7 = vsel %vm1719_vm0, %v1996_v54, %v1716_v20 }
 0x512   : > { %v1721_v12 = vmul.f32 %v1720_v7, %v1705_v4 }
 0x514   : > { %v1725_v58 = vmul.f32 %v1986_v6, %v1721_v12 }
 0x516   : > { %v1729_v59 = vadd.f32 %v1987_v57, %v1725_v58 }
 0x518   : > { %1766 = vmatmul.f32.vlgmr.msra.gmra.mxu2 %v1729_v59 }
 0x59b   : > { %v1767_v61 = vpop.f32.mrf.mxu2 }
 0x59c   : > { %v1768_v63 = vadd.f32 %v1988_v60, %v1767_v61 }
 0x59e   : > { %1771 = vst.msk [vmem:[%s502_s24] sm:$0xff] %vm1770_vm1, %v1768_v63 }
 0x59f   : > { %2024 = shalt.err (!%p2021_p3)
}
 0x5a0   : > { %1933 = dma.vmem_to_hbm [thread:$0]  (%p2190_p5), %s1786_s27, 128, %s1788_s3, %s1773_s16  }
 0x5a1 PF: > { %p1939_p4 = scmp.ge.s32.totalorder %s2059_s21, 2  ;;  %s1799_s0 = sand.u32 1, %s2047_s18  }
 0x5a2   : > { %s1800_s23 = scalar_lea.sflag [#allocation3], %s1799_s0 }
 0x5a3   : > { %p1936_p7 = pnand %p1939_p4, %p2194_p6 }
 0x5a5   : > { %p1937_p8 = pneg %p1936_p7 }
 0x5a7   : > { %2042 = dma.done.wait (%p1937_p8), %s1800_s23, 128  }
 0x5a8   : > { %2044 = vsyncadd (%p1937_p8), %s1800_s23, 4294967168  ;;  %s2801_s21 = sld [smem:[#allocation6_spill]]  ;;  %s2804_s18 = smov %s2051_s19 }
 0x5a9   : > { %s2802_s30 = sld [smem:[#allocation5_spill]] }
 0x5aa   : > { %s2803_s20 = sld [smem:[#allocation7_spill]] }
 0x5ae   : > { %p25_p9 = scmp.ge.s32.totalorder %s2801_s21, 4  }
 0x5af   : > { %s2805_s19 = smov %s2802_s30 }
 0x5b0   :  { %27 = sbr.rel (!%p25_p9) target bundleno = 8 (0x8), region = 141 }
 0x5b5   :  { %1806 = vsyncpa [#allocation3], 1 }
 0x5b6   :  { %1808 = vsyncpa [#allocation3 + $0x1], 1 }

</bundles_post_ra>
